<compile_context>
chip_gen: v6e
topology: v6e:2x2x1
jax: 0.10.0
libtpu: 0.0.40
codegen_flags: <defaults>
</compile_context>

<pallas_src>
import jax
import jax.numpy as jnp
from jax.experimental import pallas as pl
from jax.experimental.pallas import tpu as pltpu

DIMS = (784, 512, 256, 128, 10)   # fc1..fc4
OUT_PAD = 128                     # lane-dense padded width of the final layer
TILE_MAX = 1024                   # batch-tile cap (f32 x block @1024 rows ~= 3.2 MiB)


def _mlp_kernel(x_ref,
                w1_ref, b1_ref,
                w2_ref, b2_ref,
                w3_ref, b3_ref,
                w4_ref, b4_ref,
                o_ref):
    # Entire MLP for one batch tile, fused in VMEM.  x arrives f32 and is cast to bf16
    # here (free on the VPU, overlapped with the MXU); matmuls are bf16 with f32
    # accumulation, bias+ReLU epilogues stay f32, activations cast back to bf16.
    x = x_ref[...].astype(jnp.bfloat16)                                # (TB, 784) bf16

    h1 = jnp.dot(x, w1_ref[...], preferred_element_type=jnp.float32)
    h1 = jnp.maximum(h1 + b1_ref[...], 0.0).astype(jnp.bfloat16)       # (TB, 512)

    h2 = jnp.dot(h1, w2_ref[...], preferred_element_type=jnp.float32)
    h2 = jnp.maximum(h2 + b2_ref[...], 0.0).astype(jnp.bfloat16)       # (TB, 256)

    h3 = jnp.dot(h2, w3_ref[...], preferred_element_type=jnp.float32)
    h3 = jnp.maximum(h3 + b3_ref[...], 0.0).astype(jnp.bfloat16)       # (TB, 128)

    h4 = jnp.dot(h3, w4_ref[...], preferred_element_type=jnp.float32)
    o_ref[...] = (h4 + b4_ref[...]).astype(o_ref.dtype)                # (TB, 128) bf16


def _choose_tile(n):
    """Balanced, 16-aligned (bf16 sublane-packed) batch tile.

    >= 2 grid steps whenever n >= 32 so the parallel batch axis can shard across the
    two v7x TensorCores (neutral on single-TC v5e/v6e: one extra ~0.35 us step).
    """
    min_blocks = 2 if n >= 32 else 1
    nblocks = max(pl.cdiv(n, TILE_MAX), min_blocks)
    tile = pl.cdiv(n, nblocks)
    tile = max(16, ((tile + 15) // 16) * 16)
    return tile


def simple_mnist_net_forward(x, params):
    """x: (N, 1, 28, 28) float32 (NCHW).  params: output of init_params (pre-padded).

    Returns logits (N, 10) float32.
    """
    n = x.shape[0]
    # torch .view(-1, 784); metadata-only reshape, kept in f32 (cast happens in-kernel).
    x2d = x.reshape(n, DIMS[0])

    tile_b = _choose_tile(n)
    n_pad = pl.cdiv(n, tile_b) * tile_b
    if n_pad != n:
        x2d = jnp.pad(x2d, ((0, n_pad - n), (0, 0)))

    (w1, b1), (w2, b2), (w3, b3), (w4p, b4p) = params   # fc4 already padded to 128 lanes

    weights = (w1, w2, w3, w4p)
    biases = (b1, b2, b3, b4p)

    grid = (n_pad // tile_b,)

    # x: tiled along the batch axis (double-buffered by default).
    in_specs = [pl.BlockSpec((tile_b, DIMS[0]), lambda i: (i, 0))]
    # Weights/biases: constant index_map -> resident across the grid; single-buffered
    # so we don't hold two copies of each weight in VMEM.
    single = pl.Buffered(1)
    for w, b in zip(weights, biases):
        in_specs.append(pl.BlockSpec(w.shape, lambda i: (0, 0), pipeline_mode=single))
        in_specs.append(pl.BlockSpec(b.shape, lambda i: (0, 0), pipeline_mode=single))

    out = pl.pallas_call(
        _mlp_kernel,
        out_shape=jax.ShapeDtypeStruct((n_pad, OUT_PAD), jnp.bfloat16),
        grid_spec=pltpu.PrefetchScalarGridSpec(
            num_scalar_prefetch=0,
            grid=grid,
            in_specs=in_specs,
            out_specs=pl.BlockSpec((tile_b, OUT_PAD), lambda i: (i, 0)),
        ),
        compiler_params=pltpu.CompilerParams(
            dimension_semantics=("parallel",)),
    )(x2d, w1, b1, w2, b2, w3, b3, w4p, b4p)

    # Drop batch padding / lane padding and upcast the 10 real logits to f32 (one
    # tiny fused slice+cast, replaces the former full-width f32 writeback).
    return out[:n, :DIMS[-1]].astype(jnp.float32)


def init_params(key):
    """Deterministic init matching nn.Linear shapes, fully kernel-ready.

    Weights stored pre-transposed as (in_features, out_features) in bfloat16; biases in
    float32 as (1, out_features).  The final layer is padded once here to 128 output
    lanes (zeros), so the forward wrapper does no per-call weight prep.
    """
    params = []
    for i, (d_in, d_out) in enumerate(zip(DIMS[:-1], DIMS[1:])):
        kw, kb, key = jax.random.split(jax.random.fold_in(key, i), 3)
        bound = 1.0 / jnp.sqrt(d_in)
        w = jax.random.uniform(kw, (d_in, d_out), jnp.float32, -bound, bound)
        b = jax.random.uniform(kb, (1, d_out), jnp.float32, -bound, bound)
        if d_out == DIMS[-1]:   # fc4: pad to lane-dense 128-wide output, once.
            w = jnp.pad(w, ((0, 0), (0, OUT_PAD - d_out)))
            b = jnp.pad(b, ((0, 0), (0, OUT_PAD - d_out)))
        params.append((w.astype(jnp.bfloat16), b))
    return params


def _reference(x, params):
    """Pure-JAX reference with the same bf16-matmul / f32-accumulate numerics."""
    h = x.reshape(x.shape[0], -1).astype(jnp.bfloat16)
    for i, (w, b) in enumerate(params):
        h = jnp.dot(h, w, preferred_element_type=jnp.float32) + b[0]
        if i < len(params) - 1:
            h = jnp.maximum(h, 0.0).astype(jnp.bfloat16)
    return h[:, :DIMS[-1]]


if __name__ == "__main__":
    key = jax.random.PRNGKey(0)
    k_x, k_x2, k_p = jax.random.split(key, 3)
    params = init_params(k_p)

    # Small MNIST-shaped batch (single 16-row tile after padding).
    batch = 8
    x = jax.random.normal(k_x, (batch, 1, 28, 28), jnp.float32)   # NCHW
    logits = jax.block_until_ready(simple_mnist_net_forward(x, params))
    assert logits.shape == (batch, 10)
    assert logits.dtype == jnp.float32
    assert jnp.allclose(logits, _reference(x, params), atol=5e-2, rtol=5e-2)

    # Second call exercising balanced multi-step tiling (272 -> 2 x 144-row tiles).
    batch2 = 272
    x2 = jax.random.normal(k_x2, (batch2, 1, 28, 28), jnp.float32)
    logits2 = jax.block_until_ready(simple_mnist_net_forward(x2, params))
    assert logits2.shape == (batch2, 10)
    assert jnp.allclose(logits2, _reference(x2, params), atol=5e-2, rtol=5e-2)

    print("KERNEL_OK")
</pallas_src>

<mosaic_0001>
module attributes {stable_mosaic.version = 11 : i64} {
  func.func @_mlp_kernel(%arg0: i32, %arg1: memref<16x784xf32, #tpu.memory_space<vmem>>, %arg2: memref<784x512xbf16, #tpu.memory_space<vmem>>, %arg3: memref<1x512xf32, #tpu.memory_space<vmem>>, %arg4: memref<512x256xbf16, #tpu.memory_space<vmem>>, %arg5: memref<1x256xf32, #tpu.memory_space<vmem>>, %arg6: memref<256x128xbf16, #tpu.memory_space<vmem>>, %arg7: memref<1x128xf32, #tpu.memory_space<vmem>>, %arg8: memref<128x128xbf16, #tpu.memory_space<vmem>>, %arg9: memref<1x128xf32, #tpu.memory_space<vmem>>, %arg10: memref<16x128xbf16, #tpu.memory_space<vmem>>) attributes {dimension_semantics = [#tpu.dimension_semantics<parallel>], iteration_bounds = array<i64: 1>, scalar_prefetch = 0 : i64, scratch_operands = 0 : i64, tpu.core_type = #tpu.core_type<tc>, window_params = [{transform_indices = @transform_0, window_bounds = array<i64: 16, 784>}, {pipeline_mode = #tpu.pipeline_mode<synchronous>, transform_indices = @transform_1, window_bounds = array<i64: 784, 512>}, {pipeline_mode = #tpu.pipeline_mode<synchronous>, transform_indices = @transform_2, window_bounds = array<i64: 1, 512>}, {pipeline_mode = #tpu.pipeline_mode<synchronous>, transform_indices = @transform_3, window_bounds = array<i64: 512, 256>}, {pipeline_mode = #tpu.pipeline_mode<synchronous>, transform_indices = @transform_4, window_bounds = array<i64: 1, 256>}, {pipeline_mode = #tpu.pipeline_mode<synchronous>, transform_indices = @transform_5, window_bounds = array<i64: 256, 128>}, {pipeline_mode = #tpu.pipeline_mode<synchronous>, transform_indices = @transform_6, window_bounds = array<i64: 1, 128>}, {pipeline_mode = #tpu.pipeline_mode<synchronous>, transform_indices = @transform_7, window_bounds = array<i64: 128, 128>}, {pipeline_mode = #tpu.pipeline_mode<synchronous>, transform_indices = @transform_8, window_bounds = array<i64: 1, 128>}, {transform_indices = @transform_9, window_bounds = array<i64: 16, 128>}]} {
    %c0 = arith.constant 0 : index
    %c0_0 = arith.constant 0 : index
    %0 = vector.load %arg1[%c0, %c0_0] : memref<16x784xf32, #tpu.memory_space<vmem>>, vector<16x784xf32>
    %1 = arith.truncf %0 : vector<16x784xf32> to vector<16x784xbf16>
    %c0_1 = arith.constant 0 : index
    %c0_2 = arith.constant 0 : index
    %2 = vector.load %arg2[%c0_1, %c0_2] : memref<784x512xbf16, #tpu.memory_space<vmem>>, vector<784x512xbf16>
    %cst = arith.constant dense<0.000000e+00> : vector<16x512xf32>
    %3 = tpu.matmul %1, %2, %cst {dimension_numbers = #tpu.dot_dimension_numbers<[1], [0], [0], [1], [0, 0, 1, 1], [], []>} : vector<16x784xbf16>, vector<784x512xbf16>, vector<16x512xf32> -> vector<16x512xf32>
    %c0_3 = arith.constant 0 : index
    %c0_4 = arith.constant 0 : index
    %4 = vector.load %arg3[%c0_3, %c0_4] : memref<1x512xf32, #tpu.memory_space<vmem>>, vector<1x512xf32>
    %5 = vector.broadcast %4 : vector<1x512xf32> to vector<16x512xf32>
    %6 = arith.addf %3, %5 : vector<16x512xf32>
    %cst_5 = arith.constant 0.000000e+00 : f32
    %7 = vector.broadcast %cst_5 : f32 to vector<16x512xf32>
    %8 = arith.maximumf %6, %7 : vector<16x512xf32>
    %9 = arith.truncf %8 : vector<16x512xf32> to vector<16x512xbf16>
    %c0_6 = arith.constant 0 : index
    %c0_7 = arith.constant 0 : index
    %10 = vector.load %arg4[%c0_6, %c0_7] : memref<512x256xbf16, #tpu.memory_space<vmem>>, vector<512x256xbf16>
    %cst_8 = arith.constant dense<0.000000e+00> : vector<16x256xf32>
    %11 = tpu.matmul %9, %10, %cst_8 {dimension_numbers = #tpu.dot_dimension_numbers<[1], [0], [0], [1], [0, 0, 1, 1], [], []>} : vector<16x512xbf16>, vector<512x256xbf16>, vector<16x256xf32> -> vector<16x256xf32>
    %c0_9 = arith.constant 0 : index
    %c0_10 = arith.constant 0 : index
    %12 = vector.load %arg5[%c0_9, %c0_10] : memref<1x256xf32, #tpu.memory_space<vmem>>, vector<1x256xf32>
    %13 = vector.broadcast %12 : vector<1x256xf32> to vector<16x256xf32>
    %14 = arith.addf %11, %13 : vector<16x256xf32>
    %cst_11 = arith.constant 0.000000e+00 : f32
    %15 = vector.broadcast %cst_11 : f32 to vector<16x256xf32>
    %16 = arith.maximumf %14, %15 : vector<16x256xf32>
    %17 = arith.truncf %16 : vector<16x256xf32> to vector<16x256xbf16>
    %c0_12 = arith.constant 0 : index
    %c0_13 = arith.constant 0 : index
    %18 = vector.load %arg6[%c0_12, %c0_13] : memref<256x128xbf16, #tpu.memory_space<vmem>>, vector<256x128xbf16>
    %cst_14 = arith.constant dense<0.000000e+00> : vector<16x128xf32>
    %19 = tpu.matmul %17, %18, %cst_14 {dimension_numbers = #tpu.dot_dimension_numbers<[1], [0], [0], [1], [0, 0, 1, 1], [], []>} : vector<16x256xbf16>, vector<256x128xbf16>, vector<16x128xf32> -> vector<16x128xf32>
    %c0_15 = arith.constant 0 : index
    %c0_16 = arith.constant 0 : index
    %20 = vector.load %arg7[%c0_15, %c0_16] : memref<1x128xf32, #tpu.memory_space<vmem>>, vector<1x128xf32>
    %21 = vector.broadcast %20 : vector<1x128xf32> to vector<16x128xf32>
    %22 = arith.addf %19, %21 : vector<16x128xf32>
    %cst_17 = arith.constant 0.000000e+00 : f32
    %23 = vector.broadcast %cst_17 : f32 to vector<16x128xf32>
    %24 = arith.maximumf %22, %23 : vector<16x128xf32>
    %25 = arith.truncf %24 : vector<16x128xf32> to vector<16x128xbf16>
    %c0_18 = arith.constant 0 : index
    %c0_19 = arith.constant 0 : index
    %26 = vector.load %arg8[%c0_18, %c0_19] : memref<128x128xbf16, #tpu.memory_space<vmem>>, vector<128x128xbf16>
    %cst_20 = arith.constant dense<0.000000e+00> : vector<16x128xf32>
    %27 = tpu.matmul %25, %26, %cst_20 {dimension_numbers = #tpu.dot_dimension_numbers<[1], [0], [0], [1], [0, 0, 1, 1], [], []>} : vector<16x128xbf16>, vector<128x128xbf16>, vector<16x128xf32> -> vector<16x128xf32>
    %c0_21 = arith.constant 0 : index
    %c0_22 = arith.constant 0 : index
    %28 = vector.load %arg9[%c0_21, %c0_22] : memref<1x128xf32, #tpu.memory_space<vmem>>, vector<1x128xf32>
    %29 = vector.broadcast %28 : vector<1x128xf32> to vector<16x128xf32>
    %30 = arith.addf %27, %29 : vector<16x128xf32>
    %31 = arith.truncf %30 : vector<16x128xf32> to vector<16x128xbf16>
    %c0_23 = arith.constant 0 : index
    %c0_24 = arith.constant 0 : index
    %32 = vector.load %arg10[%c0_23, %c0_24] : memref<16x128xbf16, #tpu.memory_space<vmem>>, vector<16x128xbf16>
    tpu.vector_store %arg10[%c0_23, %c0_24], %31 {strides = array<i32>} : memref<16x128xbf16, #tpu.memory_space<vmem>>, vector<16x128xbf16>,
    return
  }
  func.func @transform_0(%arg0: i32) -> (i32, i32) {
    %c0_i32 = arith.constant 0 : i32
    %c0_i32_0 = arith.constant 0 : i32
    return %arg0, %c0_i32 : i32, i32
  }
  func.func @transform_1(%arg0: i32) -> (i32, i32) {
    %c0_i32 = arith.constant 0 : i32
    %c0_i32_0 = arith.constant 0 : i32
    %c0_i32_1 = arith.constant 0 : i32
    return %c0_i32, %c0_i32_0 : i32, i32
  }
  func.func @transform_2(%arg0: i32) -> (i32, i32) {
    %c0_i32 = arith.constant 0 : i32
    %c0_i32_0 = arith.constant 0 : i32
    %c0_i32_1 = arith.constant 0 : i32
    return %c0_i32, %c0_i32_0 : i32, i32
  }
  func.func @transform_3(%arg0: i32) -> (i32, i32) {
    %c0_i32 = arith.constant 0 : i32
    %c0_i32_0 = arith.constant 0 : i32
    %c0_i32_1 = arith.constant 0 : i32
    return %c0_i32, %c0_i32_0 : i32, i32
  }
  func.func @transform_4(%arg0: i32) -> (i32, i32) {
    %c0_i32 = arith.constant 0 : i32
    %c0_i32_0 = arith.constant 0 : i32
    %c0_i32_1 = arith.constant 0 : i32
    return %c0_i32, %c0_i32_0 : i32, i32
  }
  func.func @transform_5(%arg0: i32) -> (i32, i32) {
    %c0_i32 = arith.constant 0 : i32
    %c0_i32_0 = arith.constant 0 : i32
    %c0_i32_1 = arith.constant 0 : i32
    return %c0_i32, %c0_i32_0 : i32, i32
  }
  func.func @transform_6(%arg0: i32) -> (i32, i32) {
    %c0_i32 = arith.constant 0 : i32
    %c0_i32_0 = arith.constant 0 : i32
    %c0_i32_1 = arith.constant 0 : i32
    return %c0_i32, %c0_i32_0 : i32, i32
  }
  func.func @transform_7(%arg0: i32) -> (i32, i32) {
    %c0_i32 = arith.constant 0 : i32
    %c0_i32_0 = arith.constant 0 : i32
    %c0_i32_1 = arith.constant 0 : i32
    return %c0_i32, %c0_i32_0 : i32, i32
  }
  func.func @transform_8(%arg0: i32) -> (i32, i32) {
    %c0_i32 = arith.constant 0 : i32
    %c0_i32_0 = arith.constant 0 : i32
    %c0_i32_1 = arith.constant 0 : i32
    return %c0_i32, %c0_i32_0 : i32, i32
  }
  func.func @transform_9(%arg0: i32) -> (i32, i32) {
    %c0_i32 = arith.constant 0 : i32
    %c0_i32_0 = arith.constant 0 : i32
    return %arg0, %c0_i32 : i32, i32
  }
}

</mosaic_0001>

<bundles_post_ra>
// kernel: tpu_custom_call.1
= control target key start
LH: loop header
LB: loop body
LE: loop exit
PB: predicated region body
PF: predicated region fallthrough
CT: control target
= control target key end

     0   :  { %14 = vsyncpa [#allocation3], 0  ;;  %s3585_s0 = inlined_call_operand.hbm [shape: f32[16,784], index: 0, kind: input, shape index: {}]   ;;  %s3586_s1 = inlined_call_operand.hbm [shape: bf16[784,512], index: 1, kind: input, shape index: {}]   ;;  %s3587_s2 = inlined_call_operand.hbm [shape: f32[1,512], index: 2, kind: input, shape index: {}]   ;;  %s3588_s3 = inlined_call_operand.hbm [shape: bf16[512,256], index: 3, kind: input, shape index: {}]   ;;  %s3589_s4 = inlined_call_operand.vmem [shape: f32[1,256], index: 4, kind: input, shape index: {}]   ;;  %s3590_s5 = inlined_call_operand.hbm [shape: bf16[256,128], index: 5, kind: input, shape index: {}]   ;;  %s3591_s6 = inlined_call_operand.vmem [shape: f32[1,128], index: 6, kind: input, shape index: {}]   ;;  %s3592_s7 = inlined_call_operand.hbm [shape: bf16[128,128], index: 7, kind: input, shape index: {}]   ;;  %s3593_s8 = inlined_call_operand.vmem [shape: f32[1,128], index: 8, kind: input, shape index: {}]   ;;  %s3594_s9 = inlined_call_operand.hbm [shape: bf16[16,128], index: 9, kind: output, shape index: {}]  }
   0x1   :  { %15 = vsyncpa [#allocation6], 0 }
   0x2   :  { %16 = vsyncpa [#allocation9], 0 }
   0x3   :  { %17 = vsyncpa [#allocation12], 0 }
   0x4   :  { %18 = vsyncpa [#allocation4], 0  ;;  %s3432_s30 = smov [#allocation5]  }
   0x5   :  { %s36_s10 = sshll.u32 %s3432_s30, 4  ;;  %s37_s10 = int_to_ptr.vmem [resolvable:$true] %s36_s10 }
   0x6   :  { %s3290_s11 = scalar_lea.vmem %s37_s10, 25088  ;;  %p3295_p1 = scmp.lt.s32.totalorder %s37_s10, %s37_s10 }
   0x7   :  { %p3291_p0 = scmp.ne.s32.totalorder %s37_s10, %s3290_s11  ;;  %p3296_p2 = scmp.lt.s32.totalorder %s3290_s11, %s3290_s11 }
   0x9   :  { %p3297_p3 = por %p3296_p2, %p3295_p1 }
   0xb   :  { %p3298_p4 = pnand %p3297_p3, %p3291_p0 }
   0xd   :  { %3301 = shalt.err (!%p3298_p4)
}
   0xe   :  { %s3433_s12 = smov 256   ;;  %s3434_s13 = smov 16  }
   0xf   :  { %42 = dma.hbm_to_vmem [thread:$0]  %s3586_s1, 25088, %s37_s10, [#allocation6], %s3433_s12, %s3433_s12, %s3434_s13  }
  0x10   :  { %s3435_s16 = smov [#allocation8]  }
  0x11   :  { %s58_s17 = sshll.u32 %s3435_s16, 4  ;;  %s59_s17 = int_to_ptr.vmem [resolvable:$true] %s58_s17 }
  0x12   :  { %s3310_s18 = scalar_lea.vmem %s59_s17, 8192  ;;  %p3315_p6 = scmp.lt.s32.totalorder %s59_s17, %s59_s17 }
  0x13   :  { %p3311_p5 = scmp.ne.s32.totalorder %s59_s17, %s3310_s18  ;;  %p3316_p7 = scmp.lt.s32.totalorder %s3310_s18, %s3310_s18 }
  0x15   :  { %p3317_p8 = por %p3316_p7, %p3315_p6 }
  0x17   :  { %p3318_p9 = pnand %p3317_p8, %p3311_p5 }
  0x19   :  { %3321 = shalt.err (!%p3318_p9)
}
  0x1a   :  { %s3436_s19 = smov 128   ;;  %s3437_s20 = smov 8  }
  0x1b   :  { %64 = dma.hbm_to_vmem [thread:$0]  %s3588_s3, 8192, %s59_s17, [#allocation9], %s3436_s19, %s3436_s19, %s3437_s20  }
  0x1c   :  { %s3438_s23 = smov [#allocation2]  }
  0x1d   :  { %s24_s24 = sshll.u32 %s3438_s23, 4  ;;  %s25_s24 = int_to_ptr.vmem [resolvable:$true] %s24_s24 }
  0x1e   :  { %s3330_s1 = scalar_lea.vmem %s25_s24, 1792  ;;  %p3335_p11 = scmp.lt.s32.totalorder %s25_s24, %s25_s24 }
  0x1f   :  { %p3331_p10 = scmp.ne.s32.totalorder %s25_s24, %s3330_s1  ;;  %p3336_p12 = scmp.lt.s32.totalorder %s3330_s1, %s3330_s1 }
  0x21   :  { %p3337_p13 = por %p3336_p12, %p3335_p11 }
  0x23   :  { %p3338_p0 = pnand %p3337_p13, %p3331_p10 }
  0x25   :  { %3341 = shalt.err (!%p3338_p0)
}
  0x26   :  { %s3439_s25 = smov 896   ;;  %s3440_s26 = smov 56  }
  0x27   :  { %30 = dma.hbm_to_vmem [thread:$0]  %s3585_s0, 1792, %s25_s24, [#allocation3], %s3439_s25, %s3439_s25, %s3440_s26  }
  0x28   :  { %s3441_s29 = smov [#allocation7]   ;;  %s3442_s3 = smov [#allocation10]  }
  0x29   :  { %s49_s30 = sshll.u32 %s3441_s29, 4  ;;  %s72_s10 = sshll.u32 %s3442_s3, 4  ;;  %s50_s30 = int_to_ptr.vmem [resolvable:$true] %s49_s30  ;;  %s73_s10 = int_to_ptr.vmem [resolvable:$true] %s72_s10 }
  0x2a   :  { %s3350_s11 = scalar_lea.vmem %s50_s30, 64  ;;  %p3355_p2 = scmp.lt.s32.totalorder %s50_s30, %s50_s30 }
  0x2b   :  { %p3351_p1 = scmp.ne.s32.totalorder %s50_s30, %s3350_s11  ;;  %p3356_p3 = scmp.lt.s32.totalorder %s3350_s11, %s3350_s11 }
  0x2d   :  { %p3357_p4 = por %p3356_p3, %p3355_p2 }
  0x2f   :  { %p3358_p5 = pnand %p3357_p4, %p3351_p1 }
  0x31   :  { %3361 = shalt.err (!%p3358_p5)
}
  0x32   :  { %52 = dma.hbm_to_vmem [thread:$0]  %s3587_s2, 64, %s50_s30, [#allocation6]  }
  0x33   :  { %s3370_s14 = scalar_lea.vmem %s73_s10, 2048  ;;  %p3375_p7 = scmp.lt.s32.totalorder %s73_s10, %s73_s10 }
  0x34   :  { %p3371_p6 = scmp.ne.s32.totalorder %s73_s10, %s3370_s14  ;;  %p3376_p8 = scmp.lt.s32.totalorder %s3370_s14, %s3370_s14 }
  0x36   :  { %p3377_p9 = por %p3376_p8, %p3375_p7 }
  0x38   :  { %p3378_p10 = pnand %p3377_p9, %p3371_p6 }
  0x3a   :  { %3381 = shalt.err (!%p3378_p10)
}
  0x3b   :  { %s3443_s0 = smov 64   ;;  %s3444_s15 = smov 4  }
  0x3c   :  { %78 = dma.hbm_to_vmem [thread:$0]  %s3590_s5, 2048, %s73_s10, [#allocation9], %s3443_s0, %s3443_s0, %s3444_s15  }
  0x3d   :  { %s3445_s18 = smov [#allocation11]  }
  0x3e   :  { %s86_s19 = sshll.u32 %s3445_s18, 4  ;;  %s87_s19 = int_to_ptr.vmem [resolvable:$true] %s86_s19 }
  0x3f   :  { %s3390_s2 = scalar_lea.vmem %s87_s19, 1024  ;;  %p3395_p12 = scmp.lt.s32.totalorder %s87_s19, %s87_s19 }
  0x40   :  { %p3391_p11 = scmp.ne.s32.totalorder %s87_s19, %s3390_s2  ;;  %p3396_p13 = scmp.lt.s32.totalorder %s3390_s2, %s3390_s2 }
  0x42   :  { %p3397_p0 = por %p3396_p13, %p3395_p12 }
  0x44   :  { %p3398_p1 = pnand %p3397_p0, %p3391_p11 }
  0x46   :  { %3401 = shalt.err (!%p3398_p1)
}
  0x47   :  { %92 = dma.hbm_to_vmem [thread:$0]  %s3592_s7, 1024, %s87_s19, [#allocation12], %s3443_s0, %s3443_s0, %s3444_s15  }
  0x48   :  { %3422 = dma.done.wait [#allocation3], 1792  }
  0x49   :  { %3423 = vsyncadd [#allocation3], 4294965504 }
  0x4a   :  { %3424 = dma.done.wait [#allocation6], 25152  }
  0x4b   :  { %3425 = vsyncadd [#allocation6], 4294942144 }
  0x4c   :  { %3426 = dma.done.wait [#allocation9], 10240  }
  0x4d   :  { %3427 = vsyncadd [#allocation9], 4294957056 }
  0x4e   :  { %3428 = dma.done.wait [#allocation12], 1024  }
  0x4f   :  { %3429 = vsyncadd [#allocation12], 4294966272  ;;  %v2868_v0 = vld [vmem:[#allocation5 + $0xe4] ss:$16 sps:$4 sm:$0xff]   ;;  %v2872_v2 = vld [vmem:[#allocation5 + $0xe0] ss:$16 sps:$4 sm:$0xff]  }
  0x50   :  { %v2870_v1 = vld [vmem:[#allocation5 + $0x2e4] ss:$16 sps:$4 sm:$0xff]   ;;  %1337 = vmatprep.subr.bf16.mxu0 %v2868_v0  ;;  %v2873_v3 = vld [vmem:[#allocation5 + $0x2e0] ss:$16 sps:$4 sm:$0xff]   ;;  %v115_v46 = vld [vmem:[#allocation2 + $0x8] sm:$0xff]  ;;  %vm1333_vm0 = vcmask 130048  }
  0x51   :  { %1380 = vmatprep.subr.bf16.mxu1 %v2870_v1  ;;  %v2874_v4 = vld [vmem:[#allocation5 + $0xc4] ss:$16 sps:$4 sm:$0xff]   ;;  %1338 = vmatpush1.bf16.msra.mxu0 %v2872_v2  ;;  %v2878_v6 = vld [vmem:[#allocation5 + $0xc0] ss:$16 sps:$4 sm:$0xff]   ;;  %v117_v48 = vld [vmem:[#allocation2 + $0x18] sm:$0xff]  ;;  %vm3448_vm1 = vmmov 0  }
  0x52   :  { %1381 = vmatpush1.bf16.msra.mxu1 %v2873_v3  ;;  %v2876_v5 = vld [vmem:[#allocation5 + $0x2c4] ss:$16 sps:$4 sm:$0xff]   ;;  %1339 = vmatprep.subr.bf16.mxu0 %v2874_v4  ;;  %v2879_v7 = vld [vmem:[#allocation5 + $0x2c0] ss:$16 sps:$4 sm:$0xff]   ;;  %s3449_s1 = smov [#allocation13]  }
  0x53   :  { %1382 = vmatprep.subr.bf16.mxu1 %v2876_v5  ;;  %v2880_v8 = vld [vmem:[#allocation5 + $0xa4] ss:$16 sps:$4 sm:$0xff]   ;;  %v2884_v10 = vld [vmem:[#allocation5 + $0xa0] ss:$16 sps:$4 sm:$0xff]   ;;  %s2487_s25 = sshll.u32 %s3449_s1, 4  ;;  %s2488_s25 = int_to_ptr.vmem [resolvable:$true] %s2487_s25 }
  0x54   :  { %v2882_v9 = vld [vmem:[#allocation5 + $0x2a4] ss:$16 sps:$4 sm:$0xff]   ;;  %v2885_v11 = vld [vmem:[#allocation5 + $0x2a0] ss:$16 sps:$4 sm:$0xff]   ;;  %p3407_p3 = scmp.lt.s32.totalorder %s2488_s25, %s2488_s25 }
  0x55   :  { %1340 = vmatpush1.bf16.msra.mxu0 %v2878_v6  ;;  %v2886_v12 = vld [vmem:[#allocation5 + $0x84] ss:$16 sps:$4 sm:$0xff]   ;;  %v2890_v14 = vld [vmem:[#allocation5 + $0x80] ss:$16 sps:$4 sm:$0xff]  }
  0x56   :  { %1383 = vmatpush1.bf16.msra.mxu1 %v2879_v7  ;;  %1341 = vmatprep.subr.bf16.mxu0 %v2880_v8  ;;  %v2888_v13 = vld [vmem:[#allocation5 + $0x284] ss:$16 sps:$4 sm:$0xff]   ;;  %v2891_v15 = vld [vmem:[#allocation5 + $0x280] ss:$16 sps:$4 sm:$0xff]   ;;  %v121_v7 = vld [vmem:[#allocation2 + $0x38] sm:$0xff] }
  0x57   :  { %1384 = vmatprep.subr.bf16.mxu1 %v2882_v9  ;;  %v2892_v16 = vld [vmem:[#allocation5 + $0x64] ss:$16 sps:$4 sm:$0xff]   ;;  %v2896_v18 = vld [vmem:[#allocation5 + $0x60] ss:$16 sps:$4 sm:$0xff]   ;;  %v123_v9 = vld [vmem:[#allocation2 + $0x48] sm:$0xff] }
  0x58   :  { %v2894_v17 = vld [vmem:[#allocation5 + $0x264] ss:$16 sps:$4 sm:$0xff]   ;;  %v2897_v19 = vld [vmem:[#allocation5 + $0x260] ss:$16 sps:$4 sm:$0xff]  }
  0x59   :  { %1342 = vmatpush1.bf16.msra.mxu0 %v2884_v10  ;;  %v2898_v20 = vld [vmem:[#allocation5 + $0x44] ss:$16 sps:$4 sm:$0xff]   ;;  %v2902_v22 = vld [vmem:[#allocation5 + $0x40] ss:$16 sps:$4 sm:$0xff]  }
  0x5a   :  { %1385 = vmatpush1.bf16.msra.mxu1 %v2885_v11  ;;  %1343 = vmatprep.subr.bf16.mxu0 %v2886_v12  ;;  %v2900_v21 = vld [vmem:[#allocation5 + $0x244] ss:$16 sps:$4 sm:$0xff]   ;;  %v2903_v23 = vld [vmem:[#allocation5 + $0x240] ss:$16 sps:$4 sm:$0xff]  }
  0x5b   :  { %1386 = vmatprep.subr.bf16.mxu1 %v2888_v13  ;;  %v2904_v24 = vld [vmem:[#allocation5 + $0x24] ss:$16 sps:$4 sm:$0xff]   ;;  %v2908_v26 = vld [vmem:[#allocation5 + $0x20] ss:$16 sps:$4 sm:$0xff]  }
  0x5c   :  { %v2906_v25 = vld [vmem:[#allocation5 + $0x224] ss:$16 sps:$4 sm:$0xff]   ;;  %v2909_v27 = vld [vmem:[#allocation5 + $0x220] ss:$16 sps:$4 sm:$0xff]  }
  0x5d   :  { %1344 = vmatpush1.bf16.msra.mxu0 %v2890_v14  ;;  %v2910_v28 = vld [vmem:[#allocation5 + $0x4] ss:$16 sps:$4 sm:$0xff]   ;;  %v2914_v30 = vld [vmem:[#allocation5] ss:$16 sps:$4 sm:$0xff]  }
  0x5e   :  { %1387 = vmatpush1.bf16.msra.mxu1 %v2891_v15  ;;  %1345 = vmatprep.subr.bf16.mxu0 %v2892_v16  ;;  %v2912_v29 = vld [vmem:[#allocation5 + $0x204] ss:$16 sps:$4 sm:$0xff]   ;;  %v2915_v31 = vld [vmem:[#allocation5 + $0x200] ss:$16 sps:$4 sm:$0xff]  }
  0x5f   :  { %1388 = vmatprep.subr.bf16.mxu1 %v2894_v17  ;;  %v2916_v32 = vld [vmem:[#allocation5 + $0x1e4] ss:$16 sps:$4 sm:$0xff]   ;;  %v2920_v34 = vld [vmem:[#allocation5 + $0x1e0] ss:$16 sps:$4 sm:$0xff]   ;;  %v2975_v17 = vld [vmem:[#allocation5 + $0xec] ss:$16 sps:$4 sm:$0xff]  }
  0x60   :  { %v2918_v33 = vld [vmem:[#allocation5 + $0x3e4] ss:$16 sps:$4 sm:$0xff]   ;;  %v2921_v35 = vld [vmem:[#allocation5 + $0x3e0] ss:$16 sps:$4 sm:$0xff]  }
  0x61   :  { %1346 = vmatpush1.bf16.msra.mxu0 %v2896_v18  ;;  %v2922_v36 = vld [vmem:[#allocation5 + $0x1c4] ss:$16 sps:$4 sm:$0xff]   ;;  %v2926_v38 = vld [vmem:[#allocation5 + $0x1c0] ss:$16 sps:$4 sm:$0xff]  }
  0x62   :  { %1389 = vmatpush1.bf16.msra.mxu1 %v2897_v19  ;;  %1347 = vmatprep.subr.bf16.mxu0 %v2898_v20  ;;  %v2924_v37 = vld [vmem:[#allocation5 + $0x3c4] ss:$16 sps:$4 sm:$0xff]   ;;  %v2927_v39 = vld [vmem:[#allocation5 + $0x3c0] ss:$16 sps:$4 sm:$0xff]   ;;  %v127_v20 = vld [vmem:[#allocation2 + $0x68] sm:$0xff] }
  0x63   :  { %1390 = vmatprep.subr.bf16.mxu1 %v2900_v21  ;;  %v2928_v40 = vld [vmem:[#allocation5 + $0x1a4] ss:$16 sps:$4 sm:$0xff]   ;;  %v2932_v42 = vld [vmem:[#allocation5 + $0x1a0] ss:$16 sps:$4 sm:$0xff]   ;;  %v3446_v21 = vmov 0  }
  0x64   :  { %v2930_v41 = vld [vmem:[#allocation5 + $0x3a4] ss:$16 sps:$4 sm:$0xff]   ;;  %v2933_v43 = vld [vmem:[#allocation5 + $0x3a0] ss:$16 sps:$4 sm:$0xff]  }
  0x65   :  { %1348 = vmatpush1.bf16.msra.mxu0 %v2902_v22  ;;  %v2934_v44 = vld [vmem:[#allocation5 + $0x184] ss:$16 sps:$4 sm:$0xff]   ;;  %v2938_v50 = vld [vmem:[#allocation5 + $0x180] ss:$16 sps:$4 sm:$0xff]  }
  0x66   :  { %1391 = vmatpush1.bf16.msra.mxu1 %v2903_v23  ;;  %1349 = vmatprep.subr.bf16.mxu0 %v2904_v24  ;;  %v2936_v45 = vld [vmem:[#allocation5 + $0x384] ss:$16 sps:$4 sm:$0xff]   ;;  %v2939_v51 = vld [vmem:[#allocation5 + $0x380] ss:$16 sps:$4 sm:$0xff]   ;;  %v2973_v24 = vld [vmem:[#allocation5 + $0xe8] ss:$16 sps:$4 sm:$0xff]  }
  0x67   :  { %1392 = vmatprep.subr.bf16.mxu1 %v2906_v25  ;;  %v122_v47 = vld [vmem:[#allocation2 + $0x40] sm:$0xff]  ;;  %v124_v49 = vld [vmem:[#allocation2 + $0x50] sm:$0xff] }
  0x68   :  { %v2940_v52 = vld [vmem:[#allocation5 + $0x164] ss:$16 sps:$4 sm:$0xff]   ;;  %v3524_v53 = vpack.c.bf16 %v122_v47, %v115_v46  ;;  %v3526_v54 = vpack.c.bf16 %v124_v49, %v117_v48  ;;  %v2944_v56 = vld [vmem:[#allocation5 + $0x160] ss:$16 sps:$4 sm:$0xff]   ;;  %v3003_v47 = vld [vmem:[#allocation5 + $0x48] ss:$16 sps:$4 sm:$0xff]  }
  0x69   :  { %1350 = vmatpush1.bf16.msra.mxu0 %v2908_v26  ;;  %v2942_v55 = vld [vmem:[#allocation5 + $0x364] ss:$16 sps:$4 sm:$0xff]   ;;  %v2945_v57 = vld [vmem:[#allocation5 + $0x360] ss:$16 sps:$4 sm:$0xff]   ;;  %v2981_v26 = vld [vmem:[#allocation5 + $0xcc] ss:$16 sps:$4 sm:$0xff]  }
  0x6a   :  { %1393 = vmatpush1.bf16.msra.mxu1 %v2909_v27  ;;  %1351 = vmatprep.subr.bf16.mxu0 %v2910_v28  ;;  %v2946_v58 = vld [vmem:[#allocation5 + $0x144] ss:$16 sps:$4 sm:$0xff]   ;;  %v2950_v60 = vld [vmem:[#allocation5 + $0x140] ss:$16 sps:$4 sm:$0xff]   ;;  %v2979_v28 = vld [vmem:[#allocation5 + $0xc8] ss:$16 sps:$4 sm:$0xff]  }
  0x6b   :  { %1394 = vmatprep.subr.bf16.mxu1 %v2912_v29  ;;  %1369 = vmatprep.mubr.bf16.mxu0 %v3524_v53  ;;  %v2948_v59 = vld [vmem:[#allocation5 + $0x344] ss:$16 sps:$4 sm:$0xff]   ;;  %v2951_v61 = vld [vmem:[#allocation5 + $0x340] ss:$16 sps:$4 sm:$0xff]   ;;  %v3011_v49 = vld [vmem:[#allocation5 + $0x2c] ss:$16 sps:$4 sm:$0xff]  }
  0x6c   :  { %1412 = vmatprep.mubr.bf16.mxu1 %v3526_v54  ;;  %v2952_v62 = vld [vmem:[#allocation5 + $0x124] ss:$16 sps:$4 sm:$0xff]   ;;  %v2956_v0 = vld [vmem:[#allocation5 + $0x120] ss:$16 sps:$4 sm:$0xff]  }
  0x6d   :  { %1352 = vmatpush1.bf16.msra.mxu0 %v2914_v30  ;;  %v2954_v63 = vld [vmem:[#allocation5 + $0x324] ss:$16 sps:$4 sm:$0xff]   ;;  %v2957_v1 = vld [vmem:[#allocation5 + $0x320] ss:$16 sps:$4 sm:$0xff]   ;;  %v2987_v30 = vld [vmem:[#allocation5 + $0xac] ss:$16 sps:$4 sm:$0xff]  }
  0x6e   :  { %1395 = vmatpush1.bf16.msra.mxu1 %v2915_v31  ;;  %1353 = vmatprep.subr.bf16.mxu0 %v2916_v32  ;;  %v2958_v2 = vld [vmem:[#allocation5 + $0x104] ss:$16 sps:$4 sm:$0xff]   ;;  %v2962_v4 = vld [vmem:[#allocation5 + $0x100] ss:$16 sps:$4 sm:$0xff]   ;;  %v2985_v32 = vld [vmem:[#allocation5 + $0xa8] ss:$16 sps:$4 sm:$0xff]  }
  0x6f   :  { %1396 = vmatprep.subr.bf16.mxu1 %v2918_v33  ;;  %v2960_v3 = vld [vmem:[#allocation5 + $0x304] ss:$16 sps:$4 sm:$0xff]   ;;  %v2963_v5 = vld [vmem:[#allocation5 + $0x300] ss:$16 sps:$4 sm:$0xff]  }
  0x70   :  { %v114_v6 = vld [vmem:[#allocation2] sm:$0xff]  ;;  %v116_v8 = vld [vmem:[#allocation2 + $0x10] sm:$0xff] }
  0x71   :  { %1354 = vmatpush2.bf16.msra.mxu0 %v2920_v34  ;;  %v2966_v10 = vld [vmem:[#allocation5 + $0x4e4] ss:$16 sps:$4 sm:$0xff]   ;;  %v3530_v12 = vpack.c.bf16 %v121_v7, %v114_v6  ;;  %v3532_v13 = vpack.c.bf16 %v123_v9, %v116_v8  ;;  %v2964_v14 = vld [vmem:[#allocation5 + $0x4e0] ss:$16 sps:$4 sm:$0xff]   ;;  %v2993_v34 = vld [vmem:[#allocation5 + $0x8c] ss:$16 sps:$4 sm:$0xff]  }
  0x72   :  { %1397 = vmatpush2.bf16.msra.mxu1 %v2921_v35  ;;  %1355 = vmatprep.subr.bf16.mxu0 %v2922_v36  ;;  %v2969_v11 = vld [vmem:[#allocation5 + $0x604] ss:$16 sps:$4 sm:$0xff]   ;;  %v2967_v15 = vld [vmem:[#allocation5 + $0x600] ss:$16 sps:$4 sm:$0xff]   ;;  %v2991_v36 = vld [vmem:[#allocation5 + $0x88] ss:$16 sps:$4 sm:$0xff]  }
  0x73   :  { %1398 = vmatprep.subr.bf16.mxu1 %v2924_v37  ;;  %v2972_v16 = vld [vmem:[#allocation5 + $0x4c4] ss:$16 sps:$4 sm:$0xff]   ;;  %v2970_v18 = vld [vmem:[#allocation5 + $0x4c0] ss:$16 sps:$4 sm:$0xff]   ;;  %v3041_v6 = vld [vmem:[#allocation5 + $0x18c] ss:$16 sps:$4 sm:$0xff]  }
  0x74   :  { %v120_v19 = vld [vmem:[#allocation2 + $0x30] sm:$0xff]  ;;  %v3039_v8 = vld [vmem:[#allocation5 + $0x188] ss:$16 sps:$4 sm:$0xff]  }
  0x75   :  { %1356 = vmatpush2.bf16.msra.mxu0 %v2926_v38  ;;  %v2978_v22 = vld [vmem:[#allocation5 + $0x4a4] ss:$16 sps:$4 sm:$0xff]   ;;  %v3537_v23 = vpack.c.bf16 %v127_v20, %v120_v19  ;;  %v2976_v25 = vld [vmem:[#allocation5 + $0x4a0] ss:$16 sps:$4 sm:$0xff]   ;;  %v2999_v38 = vld [vmem:[#allocation5 + $0x6c] ss:$16 sps:$4 sm:$0xff]  }
  0x76   :  { %1399 = vmatpush2.bf16.msra.mxu1 %v2927_v39  ;;  %1357 = vmatprep.subr.bf16.mxu0 %v2928_v40  ;;  %v2984_v27 = vld [vmem:[#allocation5 + $0x484] ss:$16 sps:$4 sm:$0xff]   ;;  %v2982_v29 = vld [vmem:[#allocation5 + $0x480] ss:$16 sps:$4 sm:$0xff]   ;;  %v2997_v40 = vld [vmem:[#allocation5 + $0x68] ss:$16 sps:$4 sm:$0xff]  }
  0x77   :  { %1400 = vmatprep.subr.bf16.mxu1 %v2930_v41  ;;  %v2990_v31 = vld [vmem:[#allocation5 + $0x464] ss:$16 sps:$4 sm:$0xff]   ;;  %v2988_v33 = vld [vmem:[#allocation5 + $0x460] ss:$16 sps:$4 sm:$0xff]   ;;  %v119_v41 = vld [vmem:[#allocation2 + $0x28] sm:$0xff] }
  0x78   :  { %v2996_v35 = vld [vmem:[#allocation5 + $0x444] ss:$16 sps:$4 sm:$0xff]   ;;  %v2994_v37 = vld [vmem:[#allocation5 + $0x440] ss:$16 sps:$4 sm:$0xff]  }
  0x79   :  { %1358 = vmatpush2.bf16.msra.mxu0 %v2932_v42  ;;  %v3002_v39 = vld [vmem:[#allocation5 + $0x424] ss:$16 sps:$4 sm:$0xff]   ;;  %v3006_v48 = vld [vmem:[#allocation5 + $0x400] ss:$16 sps:$4 sm:$0xff]  }
  0x7a   :  { %1401 = vmatpush2.bf16.msra.mxu1 %v2933_v43  ;;  %1359 = vmatprep.subr.bf16.mxu0 %v2934_v44  ;;  %v126_v42 = vld [vmem:[#allocation2 + $0x60] sm:$0xff] }
  0x7b   :  { %1402 = vmatprep.subr.bf16.mxu1 %v2936_v45  ;;  %v3000_v43 = vld [vmem:[#allocation5 + $0x420] ss:$16 sps:$4 sm:$0xff]   ;;  %v3542_v44 = vpack.c.bf16 %v126_v42, %v119_v41  ;;  %v3005_v45 = vld [vmem:[#allocation5 + $0x4c] ss:$16 sps:$4 sm:$0xff]   ;;  %v3008_v46 = vld [vmem:[#allocation5 + $0x404] ss:$16 sps:$4 sm:$0xff]  }
  0x7c   :  { %v3044_v7 = vld [vmem:[#allocation5 + $0x544] ss:$16 sps:$4 sm:$0xff]   ;;  %v3042_v9 = vld [vmem:[#allocation5 + $0x540] ss:$16 sps:$4 sm:$0xff]   ;;  %v3083_v41 = vld [vmem:[#allocation5 + $0x4ac] ss:$16 sps:$4 sm:$0xff]  }
  0x7d   :  { %1360 = vmatpush2.bf16.msra.mxu0 %v2938_v50  ;;  %v3014_v50 = vld [vmem:[#allocation5 + $0x5e4] ss:$16 sps:$4 sm:$0xff]   ;;  %v3054_v19 = vld [vmem:[#allocation5 + $0x500] ss:$16 sps:$4 sm:$0xff]   ;;  %v3086_v42 = vld [vmem:[#allocation5 + $0x26c] ss:$16 sps:$4 sm:$0xff]  }
  0x7e   :  { %1403 = vmatpush2.bf16.msra.mxu1 %v2939_v51  ;;  %1361 = vmatprep.subr.bf16.mxu0 %v2940_v52  ;;  %v3009_v51 = vld [vmem:[#allocation5 + $0x28] ss:$16 sps:$4 sm:$0xff]   ;;  %v3012_v52 = vld [vmem:[#allocation5 + $0x5e0] ss:$16 sps:$4 sm:$0xff]  }
  0x7f   :  { %1404 = vmatprep.subr.bf16.mxu1 %v2942_v55  ;;  %v3020_v55 = vld [vmem:[#allocation5 + $0x5c4] ss:$16 sps:$4 sm:$0xff]  }
  0x80   :  { %v118_v20 = vld [vmem:[#allocation2 + $0x20] sm:$0xff] }
  0x81   :  { %1362 = vmatpush2.bf16.msra.mxu0 %v2944_v56  ;;  %v3015_v56 = vld [vmem:[#allocation5 + $0x8] ss:$16 sps:$4 sm:$0xff]  }
  0x82   :  { %1405 = vmatpush2.bf16.msra.mxu1 %v2945_v57  ;;  %1363 = vmatprep.subr.bf16.mxu0 %v2946_v58  ;;  %v3018_v57 = vld [vmem:[#allocation5 + $0x5c0] ss:$16 sps:$4 sm:$0xff]   ;;  %v3023_v58 = vld [vmem:[#allocation5 + $0x1ec] ss:$16 sps:$4 sm:$0xff]  }
  0x83   :  { %1406 = vmatprep.subr.bf16.mxu1 %v2948_v59  ;;  %v3026_v59 = vld [vmem:[#allocation5 + $0x5a4] ss:$16 sps:$4 sm:$0xff]  }
  0x85   :  { %1364 = vmatpush2.bf16.msra.mxu0 %v2950_v60  ;;  %v3021_v60 = vld [vmem:[#allocation5 + $0x1e8] ss:$16 sps:$4 sm:$0xff]  }
  0x86   :  { %1407 = vmatpush2.bf16.msra.mxu1 %v2951_v61  ;;  %1365 = vmatprep.subr.bf16.mxu0 %v2952_v62  ;;  %v3024_v61 = vld [vmem:[#allocation5 + $0x5a0] ss:$16 sps:$4 sm:$0xff]   ;;  %v3029_v62 = vld [vmem:[#allocation5 + $0x1cc] ss:$16 sps:$4 sm:$0xff]  }
  0x87   :  { %1408 = vmatprep.subr.bf16.mxu1 %v2954_v63  ;;  %v3032_v63 = vld [vmem:[#allocation5 + $0x584] ss:$16 sps:$4 sm:$0xff]  }
  0x89   :  { %1366 = vmatpush2.bf16.msra.mxu0 %v2956_v0  ;;  %v3027_v0 = vld [vmem:[#allocation5 + $0x1c8] ss:$16 sps:$4 sm:$0xff]  }
  0x8a   :  { %1409 = vmatpush2.bf16.msra.mxu1 %v2957_v1  ;;  %1367 = vmatprep.subr.bf16.mxu0 %v2958_v2  ;;  %v3030_v1 = vld [vmem:[#allocation5 + $0x580] ss:$16 sps:$4 sm:$0xff]   ;;  %v3035_v2 = vld [vmem:[#allocation5 + $0x1ac] ss:$16 sps:$4 sm:$0xff]  }
  0x8b   :  { %1410 = vmatprep.subr.bf16.mxu1 %v2960_v3  ;;  %v3038_v3 = vld [vmem:[#allocation5 + $0x564] ss:$16 sps:$4 sm:$0xff]  }
  0x8d   :  { %1368 = vmatpush2.bf16.msra.mxu0 %v2962_v4  ;;  %v3033_v4 = vld [vmem:[#allocation5 + $0x1a8] ss:$16 sps:$4 sm:$0xff]  }
  0x8e   :  { %1411 = vmatpush2.bf16.msra.mxu1 %v2963_v5  ;;  %1423 = vmatprep.subr.bf16.mxu0 %v2966_v10  ;;  %v3036_v5 = vld [vmem:[#allocation5 + $0x560] ss:$16 sps:$4 sm:$0xff]   ;;  %v3047_v10 = vld [vmem:[#allocation5 + $0x16c] ss:$16 sps:$4 sm:$0xff]  }
  0x8f   :  { %1480 = vmatprep.subr.bf16.mxu1 %v2969_v11  ;;  %v3050_v11 = vld [vmem:[#allocation5 + $0x524] ss:$16 sps:$4 sm:$0xff]  }
  0x90   :  { %1370 = vmatmul.mubr.bf16.vlgmr.msra.gmra.mxu0 %v3530_v12 }
  0x91   :  { %1413 = vmatmul.mubr.bf16.vlgmr.msra.gmra.mxu1 %v3532_v13  ;;  %1424 = vmatpush1.bf16.msra.mxu0 %v2964_v14  ;;  %v3045_v14 = vld [vmem:[#allocation5 + $0x168] ss:$16 sps:$4 sm:$0xff]  }
  0x92   :  { %1481 = vmatpush1.bf16.msra.mxu1 %v2967_v15  ;;  %1425 = vmatprep.subr.bf16.mxu0 %v2972_v16  ;;  %v3048_v15 = vld [vmem:[#allocation5 + $0x520] ss:$16 sps:$4 sm:$0xff]   ;;  %v3053_v16 = vld [vmem:[#allocation5 + $0x14c] ss:$16 sps:$4 sm:$0xff]  }
  0x93   :  { %1498 = vmatprep.mubr.bf16.mxu1 %v3446_v21  ;;  %1509 = vmatprep.subr.bf16.mxu1 %v2975_v17  ;;  %v3056_v17 = vld [vmem:[#allocation5 + $0x504] ss:$16 sps:$4 sm:$0xff]  }
  0x94   :  { %1455 = vmatprep.mubr.bf16.mxu0 %v3542_v44 }
  0x95   :  { %1426 = vmatpush1.bf16.msra.mxu0 %v2970_v18  ;;  %v3051_v18 = vld [vmem:[#allocation5 + $0x148] ss:$16 sps:$4 sm:$0xff]  }
  0x96   :  { %1427 = vmatprep.subr.bf16.mxu0 %v2978_v22  ;;  %v125_v22 = vld [vmem:[#allocation2 + $0x58] sm:$0xff] }
  0x99   :  { %2698 = vmatmul.mubr.msk.bf16.vlgmr.msra.gmra.mxu1 %vm1333_vm0, %v3537_v23  ;;  %1428 = vmatpush1.bf16.msra.mxu0 %v2976_v25  ;;  %v3062_v25 = vld [vmem:[#allocation5 + $0x2ec] ss:$16 sps:$4 sm:$0xff]  }
  0x9a   :  { %1510 = vmatpush1.bf16.msra.mxu1 %v2973_v24  ;;  %1429 = vmatprep.subr.bf16.mxu0 %v2984_v27  ;;  %v3059_v24 = vld [vmem:[#allocation5 + $0x12c] ss:$16 sps:$4 sm:$0xff]   ;;  %v3057_v27 = vld [vmem:[#allocation5 + $0x128] ss:$16 sps:$4 sm:$0xff]  }
  0x9b   :  { %1511 = vmatprep.subr.bf16.mxu1 %v2981_v26  ;;  %1541 = vmatprep.mubr.bf16.mxu1 %v3524_v53  ;;  %v3017_v53 = vld [vmem:[#allocation5 + $0xc] ss:$16 sps:$4 sm:$0xff]   ;;  %v3545_v26 = vpack.c.bf16 %v125_v22, %v118_v20  ;;  %v3141_v20 = vld [vmem:[#allocation5 + $0x568] ss:$16 sps:$4 sm:$0xff]  }
  0x9c   :  { %v3144_v22 = vld [vmem:[#allocation5 + $0x328] ss:$16 sps:$4 sm:$0xff]  }
  0x9d   :  { %1430 = vmatpush1.bf16.msra.mxu0 %v2982_v29  ;;  %v3065_v29 = vld [vmem:[#allocation5 + $0x10c] ss:$16 sps:$4 sm:$0xff]  }
  0x9e   :  { %1512 = vmatpush1.bf16.msra.mxu1 %v2979_v28  ;;  %1431 = vmatprep.subr.bf16.mxu0 %v2990_v31  ;;  %v3060_v28 = vld [vmem:[#allocation5 + $0x2e8] ss:$16 sps:$4 sm:$0xff]  }
  0x9f   :  { %1513 = vmatprep.subr.bf16.mxu1 %v2987_v30  ;;  %v3068_v30 = vld [vmem:[#allocation5 + $0x2cc] ss:$16 sps:$4 sm:$0xff]   ;;  %v3063_v31 = vld [vmem:[#allocation5 + $0x108] ss:$16 sps:$4 sm:$0xff]  }
  0xa1   :  { %1432 = vmatpush1.bf16.msra.mxu0 %v2988_v33  ;;  %v3071_v33 = vld [vmem:[#allocation5 + $0x4ec] ss:$16 sps:$4 sm:$0xff]  }
  0xa2   :  { %1514 = vmatpush1.bf16.msra.mxu1 %v2985_v32  ;;  %1433 = vmatprep.subr.bf16.mxu0 %v2996_v35  ;;  %v3066_v32 = vld [vmem:[#allocation5 + $0x2c8] ss:$16 sps:$4 sm:$0xff]  }
  0xa3   :  { %1515 = vmatprep.subr.bf16.mxu1 %v2993_v34  ;;  %v3074_v34 = vld [vmem:[#allocation5 + $0x2ac] ss:$16 sps:$4 sm:$0xff]   ;;  %v3069_v35 = vld [vmem:[#allocation5 + $0x4e8] ss:$16 sps:$4 sm:$0xff]  }
  0xa5   :  { %1434 = vmatpush1.bf16.msra.mxu0 %v2994_v37  ;;  %v3077_v37 = vld [vmem:[#allocation5 + $0x4cc] ss:$16 sps:$4 sm:$0xff]  }
  0xa6   :  { %1516 = vmatpush1.bf16.msra.mxu1 %v2991_v36  ;;  %1435 = vmatprep.subr.bf16.mxu0 %v3002_v39  ;;  %v3072_v36 = vld [vmem:[#allocation5 + $0x2a8] ss:$16 sps:$4 sm:$0xff]  }
  0xa7   :  { %1517 = vmatprep.subr.bf16.mxu1 %v2999_v38  ;;  %v3080_v38 = vld [vmem:[#allocation5 + $0x28c] ss:$16 sps:$4 sm:$0xff]   ;;  %v3075_v39 = vld [vmem:[#allocation5 + $0x4c8] ss:$16 sps:$4 sm:$0xff]  }
  0xa9   :  { %1436 = vmatpush1.bf16.msra.mxu0 %v3000_v43  ;;  %v3081_v43 = vld [vmem:[#allocation5 + $0x4a8] ss:$16 sps:$4 sm:$0xff]  }
  0xaa   :  { %1518 = vmatpush1.bf16.msra.mxu1 %v2997_v40  ;;  %1437 = vmatprep.subr.bf16.mxu0 %v3008_v46  ;;  %v3078_v40 = vld [vmem:[#allocation5 + $0x288] ss:$16 sps:$4 sm:$0xff]   ;;  %v3092_v46 = vld [vmem:[#allocation5 + $0x24c] ss:$16 sps:$4 sm:$0xff]  }
  0xab   :  { %1519 = vmatprep.subr.bf16.mxu1 %v3005_v45  ;;  %v3084_v45 = vld [vmem:[#allocation5 + $0x268] ss:$16 sps:$4 sm:$0xff]  }
  0xad   :  { %1438 = vmatpush1.bf16.msra.mxu0 %v3006_v48  ;;  %v3095_v48 = vld [vmem:[#allocation5 + $0x46c] ss:$16 sps:$4 sm:$0xff]  }
  0xae   :  { %1520 = vmatpush1.bf16.msra.mxu1 %v3003_v47  ;;  %1439 = vmatprep.subr.bf16.mxu0 %v3014_v50  ;;  %v3087_v47 = vld [vmem:[#allocation5 + $0x488] ss:$16 sps:$4 sm:$0xff]  }
  0xaf   :  { %1521 = vmatprep.subr.bf16.mxu1 %v3011_v49  ;;  %v3098_v49 = vld [vmem:[#allocation5 + $0x22c] ss:$16 sps:$4 sm:$0xff]   ;;  %v3093_v50 = vld [vmem:[#allocation5 + $0x468] ss:$16 sps:$4 sm:$0xff]  }
  0xb1   :  { %1440 = vmatpush2.bf16.msra.mxu0 %v3012_v52  ;;  %v3101_v52 = vld [vmem:[#allocation5 + $0x44c] ss:$16 sps:$4 sm:$0xff]  }
  0xb2   :  { %1522 = vmatpush1.bf16.msra.mxu1 %v3009_v51  ;;  %1441 = vmatprep.subr.bf16.mxu0 %v3020_v55  ;;  %v3096_v51 = vld [vmem:[#allocation5 + $0x228] ss:$16 sps:$4 sm:$0xff]  }
  0xb3   :  { %1523 = vmatprep.subr.bf16.mxu1 %v3017_v53  ;;  %v3099_v53 = vld [vmem:[#allocation5 + $0x448] ss:$16 sps:$4 sm:$0xff]  }
  0xb4   :  { %v3102_v55 = vld [vmem:[#allocation5 + $0x208] ss:$16 sps:$4 sm:$0xff]  }
  0xb5   :  { %1442 = vmatpush2.bf16.msra.mxu0 %v3018_v57  ;;  %v3110_v57 = vld [vmem:[#allocation5 + $0x3ec] ss:$16 sps:$4 sm:$0xff]  }
  0xb6   :  { %1524 = vmatpush1.bf16.msra.mxu1 %v3015_v56  ;;  %1443 = vmatprep.subr.bf16.mxu0 %v3026_v59  ;;  %v3107_v56 = vld [vmem:[#allocation5 + $0x42c] ss:$16 sps:$4 sm:$0xff]   ;;  %v3108_v59 = vld [vmem:[#allocation5 + $0x3e8] ss:$16 sps:$4 sm:$0xff]  }
  0xb7   :  { %1525 = vmatprep.subr.bf16.mxu1 %v3023_v58  ;;  %v3105_v58 = vld [vmem:[#allocation5 + $0x428] ss:$16 sps:$4 sm:$0xff]  }
  0xb9   :  { %1444 = vmatpush2.bf16.msra.mxu0 %v3024_v61  ;;  %v3116_v61 = vld [vmem:[#allocation5 + $0x3cc] ss:$16 sps:$4 sm:$0xff]  }
  0xba   :  { %1526 = vmatpush2.bf16.msra.mxu1 %v3021_v60  ;;  %1445 = vmatprep.subr.bf16.mxu0 %v3032_v63  ;;  %v3113_v60 = vld [vmem:[#allocation5 + $0x40c] ss:$16 sps:$4 sm:$0xff]   ;;  %v3114_v63 = vld [vmem:[#allocation5 + $0x3c8] ss:$16 sps:$4 sm:$0xff]  }
  0xbb   :  { %1527 = vmatprep.subr.bf16.mxu1 %v3029_v62  ;;  %v3111_v62 = vld [vmem:[#allocation5 + $0x408] ss:$16 sps:$4 sm:$0xff]  }
  0xbd   :  { %1446 = vmatpush2.bf16.msra.mxu0 %v3030_v1  ;;  %v3122_v1 = vld [vmem:[#allocation5 + $0x3ac] ss:$16 sps:$4 sm:$0xff]  }
  0xbe   :  { %1528 = vmatpush2.bf16.msra.mxu1 %v3027_v0  ;;  %1447 = vmatprep.subr.bf16.mxu0 %v3038_v3  ;;  %v3119_v0 = vld [vmem:[#allocation5 + $0x5ec] ss:$16 sps:$4 sm:$0xff]   ;;  %v3120_v3 = vld [vmem:[#allocation5 + $0x3a8] ss:$16 sps:$4 sm:$0xff]  }
  0xbf   :  { %1529 = vmatprep.subr.bf16.mxu1 %v3035_v2  ;;  %v3117_v2 = vld [vmem:[#allocation5 + $0x5e8] ss:$16 sps:$4 sm:$0xff]  }
  0xc1   :  { %1448 = vmatpush2.bf16.msra.mxu0 %v3036_v5  ;;  %v3128_v5 = vld [vmem:[#allocation5 + $0x38c] ss:$16 sps:$4 sm:$0xff]  }
  0xc2   :  { %1530 = vmatpush2.bf16.msra.mxu1 %v3033_v4  ;;  %1449 = vmatprep.subr.bf16.mxu0 %v3044_v7  ;;  %v3125_v4 = vld [vmem:[#allocation5 + $0x5cc] ss:$16 sps:$4 sm:$0xff]   ;;  %v3126_v7 = vld [vmem:[#allocation5 + $0x388] ss:$16 sps:$4 sm:$0xff]  }
  0xc3   :  { %1531 = vmatprep.subr.bf16.mxu1 %v3041_v6  ;;  %v3123_v6 = vld [vmem:[#allocation5 + $0x5c8] ss:$16 sps:$4 sm:$0xff]  }
  0xc5   :  { %1450 = vmatpush2.bf16.msra.mxu0 %v3042_v9  ;;  %v3134_v9 = vld [vmem:[#allocation5 + $0x36c] ss:$16 sps:$4 sm:$0xff]  }
  0xc6   :  { %1532 = vmatpush2.bf16.msra.mxu1 %v3039_v8  ;;  %1451 = vmatprep.subr.bf16.mxu0 %v3050_v11  ;;  %v3131_v8 = vld [vmem:[#allocation5 + $0x5ac] ss:$16 sps:$4 sm:$0xff]   ;;  %v3132_v11 = vld [vmem:[#allocation5 + $0x368] ss:$16 sps:$4 sm:$0xff]  }
  0xc7   :  { %1533 = vmatprep.subr.bf16.mxu1 %v3047_v10  ;;  %v3129_v10 = vld [vmem:[#allocation5 + $0x5a8] ss:$16 sps:$4 sm:$0xff]  }
  0xc9   :  { %1452 = vmatpush2.bf16.msra.mxu0 %v3048_v15  ;;  %v3140_v15 = vld [vmem:[#allocation5 + $0x34c] ss:$16 sps:$4 sm:$0xff]  }
  0xca   :  { %1534 = vmatpush2.bf16.msra.mxu1 %v3045_v14  ;;  %1453 = vmatprep.subr.bf16.mxu0 %v3056_v17  ;;  %v3137_v14 = vld [vmem:[#allocation5 + $0x58c] ss:$16 sps:$4 sm:$0xff]   ;;  %v3138_v17 = vld [vmem:[#allocation5 + $0x348] ss:$16 sps:$4 sm:$0xff]  }
  0xcb   :  { %1535 = vmatprep.subr.bf16.mxu1 %v3053_v16  ;;  %v3135_v16 = vld [vmem:[#allocation5 + $0x588] ss:$16 sps:$4 sm:$0xff]  }
  0xcd   :  { %1454 = vmatpush2.bf16.msra.mxu0 %v3054_v19  ;;  %v3146_v19 = vld [vmem:[#allocation5 + $0x32c] ss:$16 sps:$4 sm:$0xff]  }
  0xce   :  { %1536 = vmatpush2.bf16.msra.mxu1 %v3051_v18  ;;  %1552 = vmatprep.subr.bf16.mxu0 %v3062_v25  ;;  %v3143_v18 = vld [vmem:[#allocation5 + $0x56c] ss:$16 sps:$4 sm:$0xff]  }
  0xcf   :  { %1537 = vmatprep.subr.bf16.mxu1 %v3059_v24  ;;  %v3149_v24 = vld [vmem:[#allocation5 + $0x54c] ss:$16 sps:$4 sm:$0xff]  }
  0xd0   :  { %1456 = vmatmul.mubr.bf16.vlgmr.msra.gmra.mxu0 %v3545_v26  ;;  %v3152_v25 = vld [vmem:[#allocation5 + $0x30c] ss:$16 sps:$4 sm:$0xff]  }
  0xd1   :  { %1553 = vmatpush1.bf16.msra.mxu0 %v3060_v28  ;;  %1584 = vmatprep.mubr.bf16.mxu0 %v3526_v54  ;;  %v3089_v54 = vld [vmem:[#allocation5 + $0x48c] ss:$16 sps:$4 sm:$0xff]   ;;  %v3150_v28 = vld [vmem:[#allocation5 + $0x308] ss:$16 sps:$4 sm:$0xff]  }
  0xd2   :  { %1538 = vmatpush2.bf16.msra.mxu1 %v3057_v27  ;;  %1554 = vmatprep.subr.bf16.mxu0 %v3068_v30  ;;  %v3147_v27 = vld [vmem:[#allocation5 + $0x548] ss:$16 sps:$4 sm:$0xff]   ;;  %v3158_v30 = vld [vmem:[#allocation5 + $0x60c] ss:$16 sps:$4 sm:$0xff]  }
  0xd3   :  { %1539 = vmatprep.subr.bf16.mxu1 %v3065_v29  ;;  %v3155_v29 = vld [vmem:[#allocation5 + $0x52c] ss:$16 sps:$4 sm:$0xff]  }
  0xd5   :  { %1555 = vmatpush1.bf16.msra.mxu0 %v3066_v32  ;;  %v3156_v32 = vld [vmem:[#allocation5 + $0x608] ss:$16 sps:$4 sm:$0xff]  }
  0xd6   :  { %1540 = vmatpush2.bf16.msra.mxu1 %v3063_v31  ;;  %1556 = vmatprep.subr.bf16.mxu0 %v3074_v34  ;;  %v3153_v31 = vld [vmem:[#allocation5 + $0x528] ss:$16 sps:$4 sm:$0xff]  }
  0xd7   :  { %1595 = vmatprep.subr.bf16.mxu1 %v3071_v33  ;;  %v3161_v33 = vld [vmem:[#allocation5 + $0x50c] ss:$16 sps:$4 sm:$0xff]   ;;  %v3164_v34 = vld [vmem:[#allocation8 + $0x74] ss:$8 sps:$4 sm:$0xff]  }
  0xd9   :  { %1542 = vmatmul.mubr.bf16.vlgmr.msra.gmra.mxu1 %v3530_v12  ;;  %1557 = vmatpush1.bf16.msra.mxu0 %v3072_v36  ;;  %v3090_v12 = vld [vmem:[#allocation5 + $0x248] ss:$16 sps:$4 sm:$0xff]   ;;  %v3162_v36 = vld [vmem:[#allocation8 + $0x70] ss:$8 sps:$4 sm:$0xff]  }
  0xda   :  { %1596 = vmatpush1.bf16.msra.mxu1 %v3069_v35  ;;  %1558 = vmatprep.subr.bf16.mxu0 %v3080_v38  ;;  %v3159_v35 = vld [vmem:[#allocation5 + $0x508] ss:$16 sps:$4 sm:$0xff]   ;;  %v3165_v38 = vld [vmem:[#allocation8 + $0x60] ss:$8 sps:$4 sm:$0xff]  }
  0xdb   :  { %1597 = vmatprep.subr.bf16.mxu1 %v3077_v37  ;;  %1627 = vmatprep.mubr.bf16.mxu1 %v3542_v44  ;;  %v3104_v44 = vld [vmem:[#allocation5 + $0x20c] ss:$16 sps:$4 sm:$0xff]   ;;  %v3167_v37 = vld [vmem:[#allocation8 + $0x64] ss:$8 sps:$4 sm:$0xff]  }
  0xdd   :  { %1559 = vmatpush1.bf16.msra.mxu0 %v3078_v40  ;;  %v3173_v40 = vld [vmem:[#allocation8 + $0x44] ss:$8 sps:$4 sm:$0xff]  }
  0xde   :  { %1598 = vmatpush1.bf16.msra.mxu1 %v3075_v39  ;;  %1560 = vmatprep.subr.bf16.mxu0 %v3086_v42  ;;  %v3170_v39 = vld [vmem:[#allocation8 + $0x54] ss:$8 sps:$4 sm:$0xff]  }
  0xdf   :  { %1599 = vmatprep.subr.bf16.mxu1 %v3083_v41  ;;  %v3210_v41 = vld [vmem:[#allocation8 + $0x170] ss:$8 sps:$4 sm:$0xff]   ;;  %v3212_v42 = vld [vmem:[#allocation8 + $0x174] ss:$8 sps:$4 sm:$0xff]  }
  0xe1   :  { %1561 = vmatpush1.bf16.msra.mxu0 %v3084_v45  ;;  %v3176_v45 = vld [vmem:[#allocation8 + $0x34] ss:$8 sps:$4 sm:$0xff]  }
  0xe2   :  { %1600 = vmatpush1.bf16.msra.mxu1 %v3081_v43  ;;  %1562 = vmatprep.subr.bf16.mxu0 %v3092_v46  ;;  %v3215_v43 = vld [vmem:[#allocation8 + $0x164] ss:$8 sps:$4 sm:$0xff]  }
  0xe3   :  { %1601 = vmatprep.subr.bf16.mxu1 %v3089_v54  ;;  %v3174_v54 = vld [vmem:[#allocation8 + $0x30] ss:$8 sps:$4 sm:$0xff]   ;;  %v3179_v46 = vld [vmem:[#allocation8 + $0x24] ss:$8 sps:$4 sm:$0xff]  }
  0xe5   :  { %1563 = vmatpush1.bf16.msra.mxu0 %v3090_v12  ;;  %v3221_v12 = vld [vmem:[#allocation8 + $0x144] ss:$8 sps:$4 sm:$0xff]  }
  0xe6   :  { %1602 = vmatpush1.bf16.msra.mxu1 %v3087_v47  ;;  %1564 = vmatprep.subr.bf16.mxu0 %v3098_v49  ;;  %v3216_v47 = vld [vmem:[#allocation8 + $0x150] ss:$8 sps:$4 sm:$0xff]   ;;  %v3182_v49 = vld [vmem:[#allocation8 + $0x14] ss:$8 sps:$4 sm:$0xff]  }
  0xe7   :  { %1603 = vmatprep.subr.bf16.mxu1 %v3095_v48  ;;  %v3177_v48 = vld [vmem:[#allocation8 + $0x20] ss:$8 sps:$4 sm:$0xff]  }
  0xe9   :  { %1565 = vmatpush1.bf16.msra.mxu0 %v3096_v51  ;;  %v3224_v51 = vld [vmem:[#allocation8 + $0x134] ss:$8 sps:$4 sm:$0xff]  }
  0xea   :  { %1604 = vmatpush1.bf16.msra.mxu1 %v3093_v50  ;;  %1566 = vmatprep.subr.bf16.mxu0 %v3104_v44  ;;  %v3219_v50 = vld [vmem:[#allocation8 + $0x140] ss:$8 sps:$4 sm:$0xff]   ;;  %v3185_v44 = vld [vmem:[#allocation8 + $0x4] ss:$8 sps:$4 sm:$0xff]  }
  0xeb   :  { %1605 = vmatprep.subr.bf16.mxu1 %v3101_v52  ;;  %v3180_v52 = vld [vmem:[#allocation8 + $0x10] ss:$8 sps:$4 sm:$0xff]  }
  0xed   :  { %1567 = vmatpush1.bf16.msra.mxu0 %v3102_v55  ;;  %v3227_v55 = vld [vmem:[#allocation8 + $0x124] ss:$8 sps:$4 sm:$0xff]  }
  0xee   :  { %1606 = vmatpush1.bf16.msra.mxu1 %v3099_v53  ;;  %1568 = vmatprep.subr.bf16.mxu0 %v3110_v57  ;;  %v3222_v53 = vld [vmem:[#allocation8 + $0x130] ss:$8 sps:$4 sm:$0xff]   ;;  %v3188_v57 = vld [vmem:[#allocation8 + $0xf4] ss:$8 sps:$4 sm:$0xff]  }
  0xef   :  { %1607 = vmatprep.subr.bf16.mxu1 %v3107_v56  ;;  %v3183_v56 = vld [vmem:[#allocation8] ss:$8 sps:$4 sm:$0xff]  }
  0xf1   :  { %1569 = vmatpush2.bf16.msra.mxu0 %v3108_v59  ;;  %v3230_v59 = vld [vmem:[#allocation8 + $0x114] ss:$8 sps:$4 sm:$0xff]  }
  0xf2   :  { %1608 = vmatpush1.bf16.msra.mxu1 %v3105_v58  ;;  %1570 = vmatprep.subr.bf16.mxu0 %v3116_v61  ;;  %v3225_v58 = vld [vmem:[#allocation8 + $0x120] ss:$8 sps:$4 sm:$0xff]   ;;  %v3191_v61 = vld [vmem:[#allocation8 + $0xe4] ss:$8 sps:$4 sm:$0xff]  }
  0xf3   :  { %1609 = vmatprep.subr.bf16.mxu1 %v3113_v60  ;;  %v3186_v60 = vld [vmem:[#allocation8 + $0xf0] ss:$8 sps:$4 sm:$0xff]  }
  0xf5   :  { %1571 = vmatpush2.bf16.msra.mxu0 %v3114_v63  ;;  %v3233_v63 = vld [vmem:[#allocation8 + $0x104] ss:$8 sps:$4 sm:$0xff]  }
  0xf6   :  { %1610 = vmatpush1.bf16.msra.mxu1 %v3111_v62  ;;  %1572 = vmatprep.subr.bf16.mxu0 %v3122_v1  ;;  %v3228_v62 = vld [vmem:[#allocation8 + $0x110] ss:$8 sps:$4 sm:$0xff]   ;;  %v3194_v1 = vld [vmem:[#allocation8 + $0xd4] ss:$8 sps:$4 sm:$0xff]  }
  0xf7   :  { %1611 = vmatprep.subr.bf16.mxu1 %v3119_v0  ;;  %v3189_v0 = vld [vmem:[#allocation8 + $0xe0] ss:$8 sps:$4 sm:$0xff]  }
  0xf9   :  { %1573 = vmatpush2.bf16.msra.mxu0 %v3120_v3  ;;  %v3236_v3 = vld [vmem:[#allocation8 + $0x1f4] ss:$8 sps:$4 sm:$0xff]  }
  0xfa   :  { %1612 = vmatpush2.bf16.msra.mxu1 %v3117_v2  ;;  %1574 = vmatprep.subr.bf16.mxu0 %v3128_v5  ;;  %v3231_v2 = vld [vmem:[#allocation8 + $0x100] ss:$8 sps:$4 sm:$0xff]   ;;  %v3197_v5 = vld [vmem:[#allocation8 + $0xc4] ss:$8 sps:$4 sm:$0xff]  }
  0xfb   :  { %1613 = vmatprep.subr.bf16.mxu1 %v3125_v4  ;;  %v3192_v4 = vld [vmem:[#allocation8 + $0xd0] ss:$8 sps:$4 sm:$0xff]  }
  0xfd   :  { %1575 = vmatpush2.bf16.msra.mxu0 %v3126_v7  ;;  %v3239_v7 = vld [vmem:[#allocation8 + $0x1e4] ss:$8 sps:$4 sm:$0xff]  }
  0xfe   :  { %1614 = vmatpush2.bf16.msra.mxu1 %v3123_v6  ;;  %1576 = vmatprep.subr.bf16.mxu0 %v3134_v9  ;;  %v3234_v6 = vld [vmem:[#allocation8 + $0x1f0] ss:$8 sps:$4 sm:$0xff]   ;;  %v3200_v9 = vld [vmem:[#allocation8 + $0xb4] ss:$8 sps:$4 sm:$0xff]  }
  0xff   :  { %1615 = vmatprep.subr.bf16.mxu1 %v3131_v8  ;;  %v3195_v8 = vld [vmem:[#allocation8 + $0xc0] ss:$8 sps:$4 sm:$0xff]  }
 0x101   :  { %1577 = vmatpush2.bf16.msra.mxu0 %v3132_v11  ;;  %v3242_v11 = vld [vmem:[#allocation8 + $0x1d4] ss:$8 sps:$4 sm:$0xff]  }
 0x102   :  { %1616 = vmatpush2.bf16.msra.mxu1 %v3129_v10  ;;  %1578 = vmatprep.subr.bf16.mxu0 %v3140_v15  ;;  %v3237_v10 = vld [vmem:[#allocation8 + $0x1e0] ss:$8 sps:$4 sm:$0xff]   ;;  %v3203_v15 = vld [vmem:[#allocation8 + $0xa4] ss:$8 sps:$4 sm:$0xff]  }
 0x103   :  { %1617 = vmatprep.subr.bf16.mxu1 %v3137_v14  ;;  %v3198_v14 = vld [vmem:[#allocation8 + $0xb0] ss:$8 sps:$4 sm:$0xff]  }
 0x105   :  { %1579 = vmatpush2.bf16.msra.mxu0 %v3138_v17  ;;  %v3201_v17 = vld [vmem:[#allocation8 + $0xa0] ss:$8 sps:$4 sm:$0xff]  }
 0x106   :  { %1618 = vmatpush2.bf16.msra.mxu1 %v3135_v16  ;;  %1580 = vmatprep.subr.bf16.mxu0 %v3146_v19  ;;  %v3240_v16 = vld [vmem:[#allocation8 + $0x1d0] ss:$8 sps:$4 sm:$0xff]  }
 0x107   :  { %1619 = vmatprep.subr.bf16.mxu1 %v3143_v18  ;;  %v3206_v18 = vld [vmem:[#allocation8 + $0x94] ss:$8 sps:$4 sm:$0xff]   ;;  %v3204_v19 = vld [vmem:[#allocation8 + $0x90] ss:$8 sps:$4 sm:$0xff]  }
 0x109   :  { %1581 = vmatpush2.bf16.msra.mxu0 %v3144_v22  ;;  %v3207_v22 = vld [vmem:[#allocation8 + $0x80] ss:$8 sps:$4 sm:$0xff]  }
 0x10a   :  { %1620 = vmatpush2.bf16.msra.mxu1 %v3141_v20  ;;  %1582 = vmatprep.subr.bf16.mxu0 %v3152_v25  ;;  %v3209_v20 = vld [vmem:[#allocation8 + $0x84] ss:$8 sps:$4 sm:$0xff]   ;;  %v3243_v25 = vld [vmem:[#allocation8 + $0x1c0] ss:$8 sps:$4 sm:$0xff]  }
 0x10b   :  { %1621 = vmatprep.subr.bf16.mxu1 %v3149_v24  ;;  %v3245_v24 = vld [vmem:[#allocation8 + $0x1c4] ss:$8 sps:$4 sm:$0xff]  }
 0x10d   :  { %1583 = vmatpush2.bf16.msra.mxu0 %v3150_v28  ;;  %v3246_v28 = vld [vmem:[#allocation8 + $0x1b0] ss:$8 sps:$4 sm:$0xff]  }
 0x10e   :  { %1622 = vmatpush2.bf16.msra.mxu1 %v3147_v27  ;;  %1652 = vmatprep.subr.bf16.mxu0 %v3158_v30  ;;  %v3248_v27 = vld [vmem:[#allocation8 + $0x1b4] ss:$8 sps:$4 sm:$0xff]   ;;  %v3249_v30 = vld [vmem:[#allocation8 + $0x1a0] ss:$8 sps:$4 sm:$0xff]  }
 0x10f   :  { %1623 = vmatprep.subr.bf16.mxu1 %v3155_v29  ;;  %v3251_v29 = vld [vmem:[#allocation8 + $0x1a4] ss:$8 sps:$4 sm:$0xff]  }
 0x110   :  { %1585 = vmatmul.mubr.bf16.vlgmr.msra.gmra.mxu0 %v3532_v13  ;;  %v3168_v13 = vld [vmem:[#allocation8 + $0x50] ss:$8 sps:$4 sm:$0xff]  }
 0x111   :  { %1653 = vmatpush1.bf16.msra.mxu0 %v3156_v32  ;;  %1670 = vmatprep.mubr.bf16.mxu0 %v3446_v21  ;;  %v3171_v21 = vld [vmem:[#allocation8 + $0x40] ss:$8 sps:$4 sm:$0xff]   ;;  %v3252_v32 = vld [vmem:[#allocation8 + $0x190] ss:$8 sps:$4 sm:$0xff]  }
 0x112   :  { %1624 = vmatpush2.bf16.msra.mxu1 %v3153_v31  ;;  %2089 = vmatprep.subr.bf16.mxu0 %v3164_v34  ;;  %v3254_v31 = vld [vmem:[#allocation8 + $0x194] ss:$8 sps:$4 sm:$0xff]   ;;  %v3255_v34 = vld [vmem:[#allocation8 + $0x180] ss:$8 sps:$4 sm:$0xff]  }
 0x113   :  { %1625 = vmatprep.subr.bf16.mxu1 %v3161_v33  ;;  %v3257_v33 = vld [vmem:[#allocation8 + $0x184] ss:$8 sps:$4 sm:$0xff]  }
 0x116   :  { %1626 = vmatpush2.bf16.msra.mxu1 %v3159_v35 }
 0x117   :  { %2132 = vmatprep.subr.bf16.mxu1 %v3212_v42 }
 0x118   :  { %2699 = vmatmul.mubr.msk.bf16.vlgmr.msra.gmra.mxu0 %vm1333_vm0, %v3537_v23  ;;  %v3218_v23 = vld [vmem:[#allocation8 + $0x154] ss:$8 sps:$4 sm:$0xff]  }
 0x119   :  { %1628 = vmatmul.mubr.bf16.vlgmr.msra.gmra.mxu1 %v3545_v26  ;;  %2090 = vmatpush1.bf16.msra.mxu0 %v3162_v36  ;;  %v3213_v26 = vld [vmem:[#allocation8 + $0x160] ss:$8 sps:$4 sm:$0xff]   ;;  %v333_v36 = vlaneseq }
 0x11a   :  { %2091 = vmatprep.subr.bf16.mxu0 %v3167_v37  ;;  %2133 = vmatpush1.bf16.msra.mxu1 %v3210_v41 }
 0x11b   :  { %2134 = vmatprep.subr.bf16.mxu1 %v3215_v43 }
 0x11d   :  { %2092 = vmatpush1.bf16.msra.mxu0 %v3165_v38  ;;  %v3556_v38 = vshrl.u32 %v333_v36, 7 }
 0x11e   :  { %2093 = vmatprep.subr.bf16.mxu0 %v3170_v39  ;;  %2135 = vmatpush1.bf16.msra.mxu1 %v3213_v26 }
 0x11f   :  { %2136 = vmatprep.subr.bf16.mxu1 %v3218_v23  ;;  %v335_v41 = vsub.s32 0, %v3556_v38 }
 0x121   :  { %2094 = vmatpush1.bf16.msra.mxu0 %v3168_v13 }
 0x122   :  { %2095 = vmatprep.subr.bf16.mxu0 %v3173_v40  ;;  %2137 = vmatpush1.bf16.msra.mxu1 %v3216_v47  ;;  %v339_v40 = vsub.s32 1, %v3556_v38 }
 0x123   :  { %2138 = vmatprep.subr.bf16.mxu1 %v3221_v12 }
 0x125   :  { %2096 = vmatpush1.bf16.msra.mxu0 %v3171_v21  ;;  %v331_v21 = vld [vmem:[#allocation7] sm:$0xf] }
 0x126   :  { %2097 = vmatprep.subr.bf16.mxu0 %v3176_v45  ;;  %2139 = vmatpush1.bf16.msra.mxu1 %v3219_v50  ;;  %v340_v45 = vrot.slane %v331_v21, %v339_v40  ;;  %v336_v26 = vrot.slane %v331_v21, %v335_v41 }
 0x127   :  { %2140 = vmatprep.subr.bf16.mxu1 %v3224_v51 }
 0x129   :  { %2098 = vmatpush1.bf16.msra.mxu0 %v3174_v54 }
 0x12a   :  { %2099 = vmatprep.subr.bf16.mxu0 %v3179_v46  ;;  %2141 = vmatpush1.bf16.msra.mxu1 %v3222_v53 }
 0x12b   :  { %2142 = vmatprep.subr.bf16.mxu1 %v3227_v55 }
 0x12d   :  { %2100 = vmatpush1.bf16.msra.mxu0 %v3177_v48 }
 0x12e   :  { %2101 = vmatprep.subr.bf16.mxu0 %v3182_v49  ;;  %2143 = vmatpush1.bf16.msra.mxu1 %v3225_v58 }
 0x12f   :  { %2144 = vmatprep.subr.bf16.mxu1 %v3230_v59 }
 0x131   :  { %2102 = vmatpush1.bf16.msra.mxu0 %v3180_v52 }
 0x132   :  { %2103 = vmatprep.subr.bf16.mxu0 %v3185_v44  ;;  %2145 = vmatpush1.bf16.msra.mxu1 %v3228_v62 }
 0x133   :  { %2146 = vmatprep.subr.bf16.mxu1 %v3233_v63 }
 0x135   :  { %2104 = vmatpush1.bf16.msra.mxu0 %v3183_v56 }
 0x136   :  { %2105 = vmatprep.subr.bf16.mxu0 %v3188_v57  ;;  %2147 = vmatpush1.bf16.msra.mxu1 %v3231_v2 }
 0x137   :  { %2148 = vmatprep.subr.bf16.mxu1 %v3236_v3 }
 0x139   :  { %2106 = vmatpush2.bf16.msra.mxu0 %v3186_v60 }
 0x13a   :  { %2107 = vmatprep.subr.bf16.mxu0 %v3191_v61  ;;  %2149 = vmatpush2.bf16.msra.mxu1 %v3234_v6 }
 0x13b   :  { %2150 = vmatprep.subr.bf16.mxu1 %v3239_v7 }
 0x13d   :  { %2108 = vmatpush2.bf16.msra.mxu0 %v3189_v0 }
 0x13e   :  { %2109 = vmatprep.subr.bf16.mxu0 %v3194_v1  ;;  %2151 = vmatpush2.bf16.msra.mxu1 %v3237_v10 }
 0x13f   :  { %2152 = vmatprep.subr.bf16.mxu1 %v3242_v11 }
 0x141   :  { %2110 = vmatpush2.bf16.msra.mxu0 %v3192_v4 }
 0x142   :  { %2111 = vmatprep.subr.bf16.mxu0 %v3197_v5  ;;  %2153 = vmatpush2.bf16.msra.mxu1 %v3240_v16  ;;  %v343_v16 = vsub.s32 2, %v3556_v38 }
 0x143   :  { %2154 = vmatprep.subr.bf16.mxu1 %v3245_v24 }
 0x145   :  { %2112 = vmatpush2.bf16.msra.mxu0 %v3195_v8 }
 0x146   :  { %2113 = vmatprep.subr.bf16.mxu0 %v3200_v9  ;;  %2155 = vmatpush2.bf16.msra.mxu1 %v3243_v25 }
 0x147   :  { %2156 = vmatprep.subr.bf16.mxu1 %v3248_v27 }
 0x149   :  { %2114 = vmatpush2.bf16.msra.mxu0 %v3198_v14 }
 0x14a   :  { %2115 = vmatprep.subr.bf16.mxu0 %v3203_v15  ;;  %2157 = vmatpush2.bf16.msra.mxu1 %v3246_v28  ;;  %v347_v15 = vsub.s32 3, %v3556_v38 }
 0x14b   :  { %2158 = vmatprep.subr.bf16.mxu1 %v3251_v29 }
 0x14d   :  { %2116 = vmatpush2.bf16.msra.mxu0 %v3201_v17 }
 0x14e   :  { %2117 = vmatprep.subr.bf16.mxu0 %v3206_v18  ;;  %2159 = vmatpush2.bf16.msra.mxu1 %v3249_v30 }
 0x14f   :  { %2160 = vmatprep.subr.bf16.mxu1 %v3254_v31 }
 0x150   :  { %v1371_v39 = vpop.f32.mrf.mxu0 }
 0x151   :  { %2118 = vmatpush2.bf16.msra.mxu0 %v3204_v19  ;;  %v1414_v35 = vpop.f32.mrf.mxu1  ;;  %v1372_v47 = vadd.f32 %v1371_v39, %v336_v26 }
 0x152   :  { %2119 = vmatprep.subr.bf16.mxu0 %v3209_v20  ;;  %2161 = vmatpush2.bf16.msra.mxu1 %v3252_v32  ;;  %v1373_v42 = vpop.f32.mrf.mxu0  ;;  %v348_v20 = vrot.slane %v331_v21, %v347_v15 }
 0x153   :  { %2162 = vmatprep.subr.bf16.mxu1 %v3257_v33  ;;  %v1416_v37 = vpop.f32.mrf.mxu1  ;;  %v1374_v46 = vadd.f32 %v1373_v42, %v340_v45  ;;  %v1415_v44 = vadd.f32 %v1414_v35, %v1372_v47 }
 0x154   :  { %v1375_v23 = vpop.f32.mrf.mxu0 }
 0x155   :  { %2120 = vmatpush2.bf16.msra.mxu0 %v3207_v22  ;;  %v1418_v13 = vpop.f32.mrf.mxu1  ;;  %v1376_v48 = vadd.f32 %v1375_v23, %v336_v26  ;;  %v1417_v51 = vadd.f32 %v1416_v37, %v1374_v46  ;;  %v344_v22 = vrot.slane %v331_v21, %v343_v16 }
 0x156   :  { %2163 = vmatpush2.bf16.msra.mxu1 %v3255_v34  ;;  %v1377_v12 = vpop.f32.mrf.mxu0 }
 0x157   :  { %v1420_v43 = vpop.f32.mrf.mxu1  ;;  %v1378_v52 = vadd.f32 %v1377_v12, %v340_v45  ;;  %v1419_v55 = vadd.f32 %v1418_v13, %v1376_v48 }
 0x159   :  { %v1500_v54 = vpop.f32.mrf.mxu1  ;;  %v1421_v60 = vadd.f32 %v1420_v43, %v1378_v52 }
 0x15b   :  { %v1502_v49 = vpop.f32.mrf.mxu1 }
 0x15d   :  { %v1504_v57 = vpop.f32.mrf.mxu1 }
 0x15f   :  { %v1506_v2 = vpop.f32.mrf.mxu1 }
 0x190   :  { %v1457_v50 = vpop.f32.mrf.mxu0 }
 0x191   :  { %v1458_v58 = vadd.f32 %v1457_v50, %v1415_v44 }
 0x192   :  { %v1459_v53 = vpop.f32.mrf.mxu0 }
 0x193   :  { %v1460_v56 = vadd.f32 %v1459_v53, %v1417_v51  ;;  %v1501_v3 = vadd.f32 %v1500_v54, %v1458_v58  ;;  %v3260_v58 = vld [vmem:[#allocation10 + $0x70] sm:$0xff]  }
 0x194   :  { %v1461_v59 = vpop.f32.mrf.mxu0 }
 0x195   :  { %v1462_v61 = vadd.f32 %v1461_v59, %v1419_v55  ;;  %v1503_v63 = vadd.f32 %v1502_v49, %v1460_v56  ;;  %v1681_v8 = vmax.f32 %v1501_v3, 0.0  ;;  %v3258_v56 = vld [vmem:[#allocation10 + $0x78] sm:$0xff]   ;;  %v3261_v59 = vld [vmem:[#allocation10 + $0x30] sm:$0xff]  }
 0x196   :  { %v1463_v62 = vpop.f32.mrf.mxu0  ;;  %2799 = vmatprep.subr.bf16.mxu0 %v3258_v56  ;;  %v3269_v3 = vld [vmem:[#allocation10 + $0x10] sm:$0xff]  }
 0x197   :  { %v1505_v0 = vadd.f32 %v1504_v57, %v1462_v61  ;;  %v1464_v1 = vadd.f32 %v1463_v62, %v1421_v60  ;;  %v1682_v6 = vmax.f32 %v1503_v63, 0.0  ;;  %v3259_v57 = vld [vmem:[#allocation10 + $0x38] sm:$0xff]   ;;  %v3262_v60 = vld [vmem:[#allocation10 + $0x68] sm:$0xff]   ;;  %v3264_v62 = vld [vmem:[#allocation10 + $0x60] sm:$0xff]  }
 0x198   :  { %v3263_v61 = vld [vmem:[#allocation10 + $0x28] sm:$0xff]   ;;  %v3265_v63 = vld [vmem:[#allocation10 + $0x20] sm:$0xff]  }
 0x199   :  { %v1507_v4 = vadd.f32 %v1506_v2, %v1464_v1  ;;  %v1685_v5 = vmax.f32 %v1505_v0, 0.0  ;;  %v1543_v11 = vpop.f32.mrf.mxu1  ;;  %v3266_v0 = vld [vmem:[#allocation10 + $0x58] sm:$0xff]   ;;  %v3268_v2 = vld [vmem:[#allocation10 + $0x50] sm:$0xff]  }
 0x19a   :  { %v1544_v29 = vadd.f32 %v1543_v11, %v344_v22  ;;  %v3267_v1 = vld [vmem:[#allocation10 + $0x18] sm:$0xff]   ;;  %v3276_v11 = vld [vmem:[#allocation11 + $0x28] sm:$0xff]  }
 0x19b   :  { %v1686_v7 = vmax.f32 %v1507_v4, 0.0  ;;  %v1689_v10 = vpack.c.bf16 %v1685_v5, %v1681_v8  ;;  %v1545_v14 = vpop.f32.mrf.mxu1  ;;  %v3270_v4 = vld [vmem:[#allocation10 + $0x48] sm:$0xff]   ;;  %v3274_v8 = vld [vmem:[#allocation11 + $0x38] sm:$0xff]  }
 0x19c   :  { %v1546_v28 = vadd.f32 %v1545_v14, %v348_v20  ;;  %v3271_v5 = vld [vmem:[#allocation10 + $0x8] sm:$0xff]   ;;  %v3277_v14 = vld [vmem:[#allocation11 + $0x20] sm:$0xff]  }
 0x19d   :  { %v1690_v9 = vpack.c.bf16 %v1686_v7, %v1682_v6  ;;  %v1547_v18 = vpop.f32.mrf.mxu1  ;;  %v3272_v6 = vld [vmem:[#allocation10 + $0x40] sm:$0xff]  }
 0x19e   :  { %v1548_v32 = vadd.f32 %v1547_v18, %v344_v22  ;;  %v3273_v7 = vld [vmem:[#allocation10] sm:$0xff]  }
 0x19f   :  { %2121 = vmatprep.mubr.bf16.mxu0 %v1690_v9  ;;  %v1549_v25 = vpop.f32.mrf.mxu1  ;;  %v3447_v9 = vmov 0.0  }
 0x1a0   :  { %2122 = vmatmul.mubr.bf16.vlgmr.msra.gmra.mxu0 %v1689_v10  ;;  %v1550_v37 = vadd.f32 %v1549_v25, %v348_v20  ;;  %2830 = vmatprep.subr.bf16.mxu1 %v3447_v9  ;;  %v3275_v10 = vld [vmem:[#allocation11 + $0x30] sm:$0xff]  }
 0x1a1   :  { %2800 = vmatpush3.bf16.msra.mxu0 %v3259_v57 }
 0x1a2   :  { %2801 = vmatprep.subr.bf16.mxu0 %v3260_v58 }
 0x1a5   :  { %2802 = vmatpush3.bf16.msra.mxu0 %v3261_v59 }
 0x1a6   :  { %2803 = vmatprep.subr.bf16.mxu0 %v3262_v60 }
 0x1a9   :  { %2804 = vmatpush3.bf16.msra.mxu0 %v3263_v61 }
 0x1aa   :  { %2805 = vmatprep.subr.bf16.mxu0 %v3264_v62 }
 0x1ad   :  { %2806 = vmatpush3.bf16.msra.mxu0 %v3265_v63 }
 0x1ae   :  { %2807 = vmatprep.subr.bf16.mxu0 %v3266_v0 }
 0x1b1   :  { %2808 = vmatpush3.bf16.msra.mxu0 %v3267_v1 }
 0x1b2   :  { %2809 = vmatprep.subr.bf16.mxu0 %v3268_v2 }
 0x1b5   :  { %2810 = vmatpush3.bf16.msra.mxu0 %v3269_v3 }
 0x1b6   :  { %2811 = vmatprep.subr.bf16.mxu0 %v3270_v4 }
 0x1b9   :  { %2812 = vmatpush3.bf16.msra.mxu0 %v3271_v5 }
 0x1ba   :  { %2813 = vmatprep.subr.bf16.mxu0 %v3272_v6 }
 0x1bd   :  { %2814 = vmatpush3.bf16.msra.mxu0 %v3273_v7 }
 0x1d0   :  { %v1586_v17 = vpop.f32.mrf.mxu0 }
 0x1d1   :  { %v1587_v34 = vadd.f32 %v1586_v17, %v1544_v29  ;;  %v1757_v17 = vld [vmem:[%s3589_s4] sm:$0x3] }
 0x1d2   :  { %v1588_v19 = vpop.f32.mrf.mxu0  ;;  %v1762_v20 = vrot.slane %v1757_v17, %v335_v41  ;;  %v3278_v41 = vld [vmem:[#allocation11 + $0x18] sm:$0xff]  }
 0x1d3   :  { %v1589_v33 = vadd.f32 %v1588_v19, %v1546_v28  ;;  %v1766_v19 = vrot.slane %v1757_v17, %v339_v40 }
 0x1d4   :  { %v1590_v24 = vpop.f32.mrf.mxu0 }
 0x1d5   :  { %v1591_v39 = vadd.f32 %v1590_v24, %v1548_v32 }
 0x1d6   :  { %v1592_v27 = vpop.f32.mrf.mxu0 }
 0x1d7   :  { %v1593_v26 = vadd.f32 %v1592_v27, %v1550_v37 }
 0x1d8   :  { %v1672_v31 = vpop.f32.mrf.mxu0 }
 0x1d9   :  { %v1629_v30 = vpop.f32.mrf.mxu1 }
 0x1da   :  { %v1674_v36 = vpop.f32.mrf.mxu0  ;;  %v1630_v42 = vadd.f32 %v1629_v30, %v1587_v34 }
 0x1db   :  { %v1631_v35 = vpop.f32.mrf.mxu1 }
 0x1dc   :  { %v1632_v13 = vadd.f32 %v1631_v35, %v1589_v33  ;;  %v1676_v45 = vpop.f32.mrf.mxu0  ;;  %v1673_v48 = vadd.f32 %v1672_v31, %v1630_v42 }
 0x1dd   :  { %v1633_v43 = vpop.f32.mrf.mxu1 }
 0x1de   :  { %v1634_v21 = vadd.f32 %v1633_v43, %v1591_v39  ;;  %v1678_v54 = vpop.f32.mrf.mxu0  ;;  %v1675_v46 = vadd.f32 %v1674_v36, %v1632_v13  ;;  %v1683_v44 = vmax.f32 %v1673_v48, 0.0  ;;  %v3279_v43 = vld [vmem:[#allocation11 + $0x10] sm:$0xff]  }
 0x1df   :  { %v1635_v23 = vpop.f32.mrf.mxu1 }
 0x1e0   :  { %v1677_v47 = vadd.f32 %v1676_v45, %v1634_v21  ;;  %v1636_v12 = vadd.f32 %v1635_v23, %v1593_v26  ;;  %v1684_v51 = vmax.f32 %v1675_v46, 0.0  ;;  %v3280_v45 = vld [vmem:[#allocation11 + $0x8] sm:$0xff]   ;;  %v3281_v26 = vld [vmem:[#allocation11] sm:$0xff]  }
 0x1e1   :  { %v2764_v46 = vld [vmem:[%s3591_s6] ss:$0 sm:$0xff]  ;;  %s3402_s6 = scalar_lea.vmem %s2488_s25, 128 }
 0x1e2   :  { %v1679_v49 = vadd.f32 %v1678_v54, %v1636_v12  ;;  %v1687_v50 = vmax.f32 %v1677_v47, 0.0  ;;  %p3403_p2 = scmp.ne.s32.totalorder %s2488_s25, %s3402_s6  ;;  %p3408_p4 = scmp.lt.s32.totalorder %s3402_s6, %s3402_s6 }
 0x1e4   :  { %v1688_v52 = vmax.f32 %v1679_v49, 0.0  ;;  %v1691_v55 = vpack.c.bf16 %v1687_v50, %v1683_v44  ;;  %p3409_p5 = por %p3408_p4, %p3407_p3 }
 0x1e6   :  { %v1692_v53 = vpack.c.bf16 %v1688_v52, %v1684_v51  ;;  %p3410_p6 = pnand %p3409_p5, %p3403_p2 }
 0x1e8   :  { %2164 = vmatprep.mubr.bf16.mxu1 %v1692_v53 }
 0x1e9   :  { %2165 = vmatmul.mubr.bf16.vlgmr.msra.gmra.mxu1 %v1691_v55  ;;  %v2781_v55 = vld [vmem:[%s3593_s8] ss:$0 sm:$0xff] }
 0x1ea   :  { %2831 = vmatpush3.bf16.msra.mxu1 %v3274_v8  ;;  %2846 = vmatprep.mubr.msk.bf16.mxu1 %vm3448_vm1, %v3447_v9 }
 0x1eb   :  { %2832 = vmatprep.subr.bf16.mxu1 %v3447_v9 }
 0x1ee   :  { %2833 = vmatpush3.bf16.msra.mxu1 %v3275_v10 }
 0x1ef   :  { %2834 = vmatprep.subr.bf16.mxu1 %v3447_v9 }
 0x1f2   :  { %2835 = vmatpush3.bf16.msra.mxu1 %v3276_v11 }
 0x1f3   :  { %2836 = vmatprep.subr.bf16.mxu1 %v3447_v9 }
 0x1f6   :  { %2837 = vmatpush3.bf16.msra.mxu1 %v3277_v14 }
 0x1f7   :  { %2838 = vmatprep.subr.bf16.mxu1 %v3447_v9 }
 0x1fa   :  { %2839 = vmatpush3.bf16.msra.mxu1 %v3278_v41 }
 0x1fb   :  { %2840 = vmatprep.subr.bf16.mxu1 %v3447_v9 }
 0x1fe   :  { %2841 = vmatpush3.bf16.msra.mxu1 %v3279_v43 }
 0x1ff   :  { %2842 = vmatprep.subr.bf16.mxu1 %v3447_v9 }
 0x202   :  { %2843 = vmatpush3.bf16.msra.mxu1 %v3280_v45 }
 0x203   :  { %2844 = vmatprep.subr.bf16.mxu1 %v3447_v9 }
 0x206   :  { %2845 = vmatpush3.bf16.msra.mxu1 %v3281_v26 }
 0x260   :  { %v2123_v15 = vpop.f32.mrf.mxu0 }
 0x261   :  { %v2124_v29 = vadd.f32 %v2123_v15, %v1762_v20 }
 0x262   :  { %v2125_v16 = vpop.f32.mrf.mxu0 }
 0x263   :  { %v2126_v27 = vadd.f32 %v2125_v16, %v1766_v19 }
 0x264   :  { %v2127_v18 = vpop.f32.mrf.mxu0 }
 0x265   :  { %v2128_v28 = vadd.f32 %v2127_v18, %v1762_v20 }
 0x266   :  { %v2129_v24 = vpop.f32.mrf.mxu0 }
 0x267   :  { %v2130_v31 = vadd.f32 %v2129_v24, %v1766_v19 }
 0x2a9   :  { %v2166_v22 = vpop.f32.mrf.mxu1 }
 0x2aa   :  { %v2167_v34 = vadd.f32 %v2166_v22, %v2124_v29 }
 0x2ab   :  { %v2168_v25 = vpop.f32.mrf.mxu1 }
 0x2ac   :  { %v2169_v32 = vadd.f32 %v2168_v25, %v2126_v27  ;;  %v2175_v40 = vmax.f32 %v2167_v34, 0.0 }
 0x2ad   :  { %v2170_v30 = vpop.f32.mrf.mxu1 }
 0x2ae   :  { %v2171_v33 = vadd.f32 %v2170_v30, %v2128_v28  ;;  %v2176_v39 = vmax.f32 %v2169_v32, 0.0 }
 0x2af   :  { %v2172_v35 = vpop.f32.mrf.mxu1 }
 0x2b0   :  { %v2173_v36 = vadd.f32 %v2172_v35, %v2130_v31  ;;  %v2177_v37 = vmax.f32 %v2171_v33, 0.0 }
 0x2b2   :  { %v2178_v13 = vmax.f32 %v2173_v36, 0.0  ;;  %v2179_v38 = vpack.c.bf16 %v2177_v37, %v2175_v40 }
 0x2b4   :  { %v2180_v42 = vpack.c.bf16 %v2178_v13, %v2176_v39 }
 0x2b6   :  { %2348 = vmatprep.mubr.bf16.mxu0 %v2180_v42 }
 0x2b7   :  { %2349 = vmatmul.mubr.bf16.vlgmr.msra.gmra.mxu0 %v2179_v38 }
 0x377   :  { %v2815_v21 = vpop.f32.mrf.mxu0 }
 0x379   :  { %v2816_v23 = vpop.f32.mrf.mxu0 }
 0x37a   :  { %v2817_v54 = vadd.f32 %v2816_v23, %v2815_v21 }
 0x37b   :  { %v2818_v47 = vpop.f32.mrf.mxu0 }
 0x37c   :  { %v2351_v48 = vadd.f32 %v2817_v54, %v2764_v46 }
 0x37d   :  { %v2819_v12 = vpop.f32.mrf.mxu0 }
 0x37e   :  { %v2820_v49 = vadd.f32 %v2819_v12, %v2818_v47  ;;  %v2357_v51 = vmax.f32 %v2351_v48, 0.0 }
 0x380   :  { %v2354_v50 = vadd.f32 %v2820_v49, %v2764_v46 }
 0x382   :  { %v2358_v52 = vmax.f32 %v2354_v50, 0.0 }
 0x384   :  { %v2359_v44 = vpack.c.bf16 %v2358_v52, %v2357_v51 }
 0x386   :  { %2847 = vmatmul.mubr.bf16.vlgmr.msra.gmra.mxu1 %v2359_v44 }
 0x446   :  { %v2465_v53 = vpop.f32.mrf.mxu1 }
 0x447   :  { %v2466_v58 = vadd.f32 %v2781_v55, %v2465_v53 }
 0x448   :  { %v2848_v56 = vpop.f32.mrf.mxu1 }
 0x44a   :  { %v2468_v57 = vpop.f32.mrf.mxu1 }
 0x44b   :  { %v2469_v59 = vadd.f32 %v2781_v55, %v2468_v57 }
 0x44c   :  { %v2849_v60 = vpop.f32.mrf.mxu1 }
 0x44d   :  { %v2797_v61 = vpack.c.bf16 %v2469_v59, %v2466_v58 }
 0x44f   :  { %2798 = vst [vmem:[#allocation13] sm:$0xff] %v2797_v61  }
 0x450   :  { %3413 = shalt.err (!%p3410_p6)
}
 0x451   :  { %2493 = dma.vmem_to_hbm [thread:$0]  %s2488_s25, 128, %s3594_s9, [#allocation4], %s3443_s0, %s3443_s0, %s3444_s15  }
 0x452   :  { %3430 = dma.done.wait [#allocation4], 128  }
 0x453   :  { %3431 = vsyncadd [#allocation4], 4294967168 }
 0x454   :  { %2497 = vsyncpa [#allocation3], 1 }
 0x455   :  { %2498 = vsyncpa [#allocation6], 1 }
 0x456   :  { %2499 = vsyncpa [#allocation9], 1 }
 0x457   :  { %2500 = vsyncpa [#allocation12], 1 }
 0x458   :  { %2501 = vsyncpa [#allocation4], 1 }

</bundles_post_ra>
